<compile_context>
chip_gen: v6e
topology: v6e:2x2x1
jax: 0.10.0
libtpu: 0.0.40
codegen_flags: <defaults>
</compile_context>

<pallas_src>
import numpy as np
import jax
import jax.numpy as jnp
from jax import lax
from jax.experimental import pallas as pl
from jax.experimental.pallas import tpu as pltpu

# ---------------- model hyper-parameters (small, consistent with the module) ----
B = 16                       # batch
INPUT = 16                   # input_size (== Conv1d sequence length L)
HIDDEN = 32                  # hidden_size (== conv channel count H)
LH = INPUT * HIDDEN          # 512 : flattened conv feature width
WIDE = LH + HIDDEN           # 544 : fused [wide | narrow] weight width
NUM_LAYERS = 3               # -> NUM_LAYERS - 1 residual FC layers
RANGES = (0, 1, 2, 3, 4)
N_OUT = len(RANGES)
SLOPE = 0.01                 # LeakyReLU negative slope
K = 3                        # conv_kernel_size, padding='same'
BN_EPS = 1e-5

# ---------------- narrow-pack row offsets (all multiples of 8 / bf16-tile 16) ---
R_WD2 = 0                                   # dense Linear(H,H)
R_WP1A = R_WD2 + HIDDEN                     # output_projection L1, rows for arg A
R_WP1B = R_WP1A + HIDDEN                    # output_projection L1, rows for arg B
R_WP2 = R_WP1B + HIDDEN                     # output_projection L2
R_RES = R_WP2 + HIDDEN                      # residual FC layers x (NUM_LAYERS-1)
R_WO = R_RES + (NUM_LAYERS - 1) * HIDDEN    # output Linear(H, N_OUT) padded to 32
R_NARROW = R_WO + HIDDEN                    # 224 rows total


def _lrelu(z):
    return jnp.where(z > 0, z, SLOPE * z)


def _mm(a, w):
    # bf16 operands on the MXU, f32 accumulation (review #3).
    return jnp.dot(a.astype(jnp.bfloat16), w, preferred_element_type=jnp.float32)


# ------------------------- shared forward math (kernel == reference) ------------
def _forward_math(x, w_f0, w_c2, w_f2, w_n):
    # ---- fused first matmul: x @ [conv_a1-conv1 banded (512 cols) | dense L1 (32)]
    z0 = _lrelu(_mm(x, w_f0))                             # (BT, 544)
    a1_flat = z0[:, :LH]                                  # conv_a1 layer-1 act, (BT, L*H)
    h1 = z0[:, LH:WIDE]                                   # dense layer-1 act, (BT, H)

    dense_out = _lrelu(_mm(h1, w_n[R_WD2:R_WD2 + HIDDEN, :]))

    # ---- conv_a1 layer 2: banded matmul, activations stay (BT, L*H) lane-dense
    conv_out = _lrelu(_mm(a1_flat, w_c2))                 # (BT, 512)

    # ---- fused: conv_out @ [conv_a2 banded (512) | post_flatten (32)]
    z2 = _lrelu(_mm(conv_out, w_f2))                      # (BT, 544)
    conv_out2 = z2[:, :LH]                                # conv_a2 output
    pf1 = z2[:, LH:WIDE]                                  # post_flatten(conv_out)

    # ---- output_projection (shared weights, used twice); concat replaced by
    #      two (H,H) dots + add (review #6)
    def out_proj(a_feat, b_feat):
        z = _lrelu(_mm(a_feat, w_n[R_WP1A:R_WP1A + HIDDEN, :])
                   + _mm(b_feat, w_n[R_WP1B:R_WP1B + HIDDEN, :]))
        return _lrelu(_mm(z, w_n[R_WP2:R_WP2 + HIDDEN, :]))

    proj1 = out_proj(dense_out, pf1)

    # ---- post_flatten on conv_a2 branch (same weight columns of w_f2) ----
    pf2 = _lrelu(_mm(conv_out2, w_f2[:, LH:WIDE]))
    y = out_proj(proj1, pf2)

    # ---- residual FC layers (Linear -> LReLU -> BN(folded) -> Dropout) + skip ----
    for r in range(NUM_LAYERS - 1):
        off = R_RES + r * HIDDEN
        y = _lrelu(_mm(y, w_n[off:off + HIDDEN, :])) + y

    # ---- output layer: Linear(H, N_OUT) padded to 32 lanes + masked softmax ----
    logits = _mm(y, w_n[R_WO:R_WO + HIDDEN, :])           # (BT, 32)
    lane = lax.broadcasted_iota(jnp.int32, logits.shape, 1)
    logits = jnp.where(lane < N_OUT, logits, jnp.float32(-1e30))
    m = jnp.max(logits, axis=-1, keepdims=True)
    e = jnp.exp(logits - m)
    return e / jnp.sum(e, axis=-1, keepdims=True)         # (BT, 32); lanes >= N_OUT ~ 0


# ------------------------------- the fused kernel -------------------------------
def hybrid_kernel(x_ref, wf0_ref, wc2_ref, wf2_ref, wn_ref, o_ref):
    o_ref[...] = _forward_math(x_ref[...], wf0_ref[...], wc2_ref[...],
                               wf2_ref[...], wn_ref[...])


# ----------------------------- parameter construction ---------------------------
def _he(key, shape, fan_in):
    # torch kaiming_normal_(a=SLOPE, nonlinearity='leaky_relu'), stored (in, out)
    gain = (2.0 / (1.0 + SLOPE * SLOPE)) ** 0.5
    std = gain / float(np.sqrt(fan_in))
    return std * np.asarray(jax.random.normal(key, shape, dtype=jnp.float32))


def make_params(key):
    ks = list(jax.random.split(key, 12))
    # Eval-mode folded BN scale (gamma=1, var=1, mean=0, beta=0 at init): per-channel
    # scale is the same scalar for every channel, shift is exactly 0 and is dropped.
    s = np.float32(1.0 / np.sqrt(1.0 + BN_EPS))

    def banded_1h(kk):
        # Conv1d(1, H, K, 'same') as a banded (L, L*H) matrix (position-major cols)
        t = _he(kk, (K, HIDDEN), 1 * K)
        W = np.zeros((INPUT, LH), np.float32)
        for lo in range(INPUT):
            for j in range(K):
                li = lo + j - K // 2
                if 0 <= li < INPUT:
                    W[li, lo * HIDDEN:(lo + 1) * HIDDEN] = t[j]
        return W

    def banded_hh(kk):
        # Conv1d(H, H, K, 'same') as a banded (L*H, L*H) matrix
        t = _he(kk, (K, HIDDEN, HIDDEN), HIDDEN * K)
        W = np.zeros((LH, LH), np.float32)
        for lo in range(INPUT):
            for j in range(K):
                li = lo + j - K // 2
                if 0 <= li < INPUT:
                    W[li * HIDDEN:(li + 1) * HIDDEN,
                      lo * HIDDEN:(lo + 1) * HIDDEN] = t[j]
        return W

    # fused first weight: [conv_a1 conv1 banded | dense Linear(INPUT, H)]
    w_f0 = np.zeros((INPUT, WIDE), np.float32)
    w_f0[:, :LH] = banded_1h(ks[0])
    w_f0[:, LH:WIDE] = _he(ks[1], (INPUT, HIDDEN), INPUT)
    w_f0 *= s                                           # both halves are BN-followed

    # conv_a1 conv2 (banded)
    w_c2 = banded_hh(ks[2]) * s

    # fused: [conv_a2 banded | post_flatten Linear(L*H, H)]
    w_f2 = np.zeros((LH, WIDE), np.float32)
    w_f2[:, :LH] = banded_hh(ks[3])
    w_f2[:, LH:WIDE] = _he(ks[4], (LH, HIDDEN), LH)     # position-major flatten order
    w_f2 *= s

    # narrow pack: all (H, H) matrices stacked row-wise
    w_n = np.zeros((R_NARROW, HIDDEN), np.float32)
    w_n[R_WD2:R_WD2 + HIDDEN] = _he(ks[5], (HIDDEN, HIDDEN), HIDDEN) * s
    wp1 = _he(ks[6], (2 * HIDDEN, HIDDEN), 2 * HIDDEN) * s
    w_n[R_WP1A:R_WP1A + HIDDEN] = wp1[:HIDDEN]          # rows for cat arg 0
    w_n[R_WP1B:R_WP1B + HIDDEN] = wp1[HIDDEN:]          # rows for cat arg 1
    w_n[R_WP2:R_WP2 + HIDDEN] = _he(ks[7], (HIDDEN, HIDDEN), HIDDEN) * s
    for r in range(NUM_LAYERS - 1):
        w_n[R_RES + r * HIDDEN:R_RES + (r + 1) * HIDDEN] = (
            _he(ks[8 + r], (HIDDEN, HIDDEN), HIDDEN) * s)
    # output layer (no BN); columns >= N_OUT stay zero and are masked in-kernel
    w_n[R_WO:R_WO + HIDDEN, :N_OUT] = _he(ks[10], (HIDDEN, N_OUT), HIDDEN)

    bf16 = lambda a: jnp.asarray(a, dtype=jnp.bfloat16)
    return bf16(w_f0), bf16(w_c2), bf16(w_f2), bf16(w_n)


# ------------------------------------ wrapper ------------------------------------
def hybrid_forward(x, w_f0, w_c2, w_f2, w_n):
    bsz = x.shape[0]
    tile = bsz if bsz <= 256 else 256            # single tile at small B (review #1)
    assert bsz % tile == 0 and tile % 8 == 0
    grid = (bsz // tile,)
    # megacore split only worth it once compute per tile exceeds the duplicated
    # per-core weight DMA (review #2)
    sem = ("arbitrary",) if grid[0] == 1 else ("parallel",)

    def wspec(w):
        return pl.BlockSpec(w.shape, lambda i: (0, 0))   # one DMA, resident for all tiles

    probs_padded = pl.pallas_call(
        hybrid_kernel,
        out_shape=jax.ShapeDtypeStruct((bsz, HIDDEN), jnp.float32),
        grid=grid,
        in_specs=[pl.BlockSpec((tile, INPUT), lambda i: (i, 0)),
                  wspec(w_f0), wspec(w_c2), wspec(w_f2), wspec(w_n)],
        # lane-dense 32-wide output store; slice to N_OUT outside (review #7)
        out_specs=pl.BlockSpec((tile, HIDDEN), lambda i: (i, 0)),
        compiler_params=pltpu.CompilerParams(dimension_semantics=sem),
    )(x, w_f0, w_c2, w_f2, w_n)
    return probs_padded[:, :N_OUT]


if __name__ == "__main__":
    key = jax.random.PRNGKey(0)
    kx, kp = jax.random.split(key)
    x = jax.random.normal(kx, (B, INPUT), dtype=jnp.float32)
    params = make_params(kp)

    out = hybrid_forward(x, *params)
    jax.block_until_ready(out)
    assert out.shape == (B, N_OUT), out.shape

    # correctness: identical math run as plain XLA (same bf16 weights, f32 accum)
    ref = _forward_math(x, *params)[:, :N_OUT]
    assert bool(jnp.allclose(out, ref, atol=2e-2, rtol=0.0)), "kernel vs reference mismatch"
    # softmax sanity: rows sum to ~1 (exact divide in kernel)
    assert bool(jnp.all(jnp.abs(jnp.sum(out, axis=-1) - 1.0) < 1e-3))
    print("KERNEL_OK")
</pallas_src>

<mosaic_0001>
module attributes {stable_mosaic.version = 11 : i64} {
  func.func @hybrid_kernel(%arg0: i32, %arg1: memref<16x16xf32, #tpu.memory_space<vmem>>, %arg2: memref<16x544xbf16, #tpu.memory_space<vmem>>, %arg3: memref<512x512xbf16, #tpu.memory_space<vmem>>, %arg4: memref<512x544xbf16, #tpu.memory_space<vmem>>, %arg5: memref<224x32xbf16, #tpu.memory_space<vmem>>, %arg6: memref<16x32xf32, #tpu.memory_space<vmem>>) attributes {dimension_semantics = [#tpu.dimension_semantics<arbitrary>], iteration_bounds = array<i64: 1>, scalar_prefetch = 0 : i64, scratch_operands = 0 : i64, tpu.core_type = #tpu.core_type<tc>, window_params = [{transform_indices = @transform_0, window_bounds = array<i64: 16, 16>}, {pipeline_mode = #tpu.pipeline_mode<synchronous>, transform_indices = @transform_1, window_bounds = array<i64: 16, 544>}, {pipeline_mode = #tpu.pipeline_mode<synchronous>, transform_indices = @transform_2, window_bounds = array<i64: 512, 512>}, {pipeline_mode = #tpu.pipeline_mode<synchronous>, transform_indices = @transform_3, window_bounds = array<i64: 512, 544>}, {pipeline_mode = #tpu.pipeline_mode<synchronous>, transform_indices = @transform_4, window_bounds = array<i64: 224, 32>}, {transform_indices = @transform_5, window_bounds = array<i64: 16, 32>}]} {
    %c0 = arith.constant 0 : index
    %c0_0 = arith.constant 0 : index
    %0 = vector.load %arg1[%c0, %c0_0] : memref<16x16xf32, #tpu.memory_space<vmem>>, vector<16x16xf32>
    %c0_1 = arith.constant 0 : index
    %c0_2 = arith.constant 0 : index
    %1 = vector.load %arg2[%c0_1, %c0_2] : memref<16x544xbf16, #tpu.memory_space<vmem>>, vector<16x544xbf16>
    %c0_3 = arith.constant 0 : index
    %c0_4 = arith.constant 0 : index
    %2 = vector.load %arg3[%c0_3, %c0_4] : memref<512x512xbf16, #tpu.memory_space<vmem>>, vector<512x512xbf16>
    %c0_5 = arith.constant 0 : index
    %c0_6 = arith.constant 0 : index
    %3 = vector.load %arg4[%c0_5, %c0_6] : memref<512x544xbf16, #tpu.memory_space<vmem>>, vector<512x544xbf16>
    %c0_7 = arith.constant 0 : index
    %c0_8 = arith.constant 0 : index
    %4 = vector.load %arg5[%c0_7, %c0_8] : memref<224x32xbf16, #tpu.memory_space<vmem>>, vector<224x32xbf16>
    %5 = arith.truncf %0 : vector<16x16xf32> to vector<16x16xbf16>
    %cst = arith.constant dense<0.000000e+00> : vector<16x544xf32>
    %6 = tpu.matmul %5, %1, %cst {dimension_numbers = #tpu.dot_dimension_numbers<[1], [0], [0], [1], [0, 0, 1, 1], [], []>} : vector<16x16xbf16>, vector<16x544xbf16>, vector<16x544xf32> -> vector<16x544xf32>
    %cst_9 = arith.constant 0.000000e+00 : f32
    %7 = vector.broadcast %cst_9 : f32 to vector<16x544xf32>
    %8 = arith.cmpf ogt, %6, %7 : vector<16x544xf32>
    %cst_10 = arith.constant 0.00999999977 : f32
    %9 = vector.broadcast %cst_10 : f32 to vector<16x544xf32>
    %10 = arith.mulf %9, %6 : vector<16x544xf32>
    %11 = arith.select %8, %6, %10 : vector<16x544xi1>, vector<16x544xf32>
    %12 = vector.extract_strided_slice %11 {offsets = [0, 0], sizes = [16, 512], strides = [1, 1]} : vector<16x544xf32> to vector<16x512xf32>
    %13 = vector.extract_strided_slice %11 {offsets = [0, 512], sizes = [16, 32], strides = [1, 1]} : vector<16x544xf32> to vector<16x32xf32>
    %14 = vector.extract_strided_slice %4 {offsets = [0, 0], sizes = [32, 32], strides = [1, 1]} : vector<224x32xbf16> to vector<32x32xbf16>
    %15 = arith.truncf %13 : vector<16x32xf32> to vector<16x32xbf16>
    %cst_11 = arith.constant dense<0.000000e+00> : vector<16x32xf32>
    %16 = tpu.matmul %15, %14, %cst_11 {dimension_numbers = #tpu.dot_dimension_numbers<[1], [0], [0], [1], [0, 0, 1, 1], [], []>} : vector<16x32xbf16>, vector<32x32xbf16>, vector<16x32xf32> -> vector<16x32xf32>
    %cst_12 = arith.constant 0.000000e+00 : f32
    %17 = vector.broadcast %cst_12 : f32 to vector<16x32xf32>
    %18 = arith.cmpf ogt, %16, %17 : vector<16x32xf32>
    %cst_13 = arith.constant 0.00999999977 : f32
    %19 = vector.broadcast %cst_13 : f32 to vector<16x32xf32>
    %20 = arith.mulf %19, %16 : vector<16x32xf32>
    %21 = arith.select %18, %16, %20 : vector<16x32xi1>, vector<16x32xf32>
    %22 = arith.truncf %12 : vector<16x512xf32> to vector<16x512xbf16>
    %cst_14 = arith.constant dense<0.000000e+00> : vector<16x512xf32>
    %23 = tpu.matmul %22, %2, %cst_14 {dimension_numbers = #tpu.dot_dimension_numbers<[1], [0], [0], [1], [0, 0, 1, 1], [], []>} : vector<16x512xbf16>, vector<512x512xbf16>, vector<16x512xf32> -> vector<16x512xf32>
    %cst_15 = arith.constant 0.000000e+00 : f32
    %24 = vector.broadcast %cst_15 : f32 to vector<16x512xf32>
    %25 = arith.cmpf ogt, %23, %24 : vector<16x512xf32>
    %cst_16 = arith.constant 0.00999999977 : f32
    %26 = vector.broadcast %cst_16 : f32 to vector<16x512xf32>
    %27 = arith.mulf %26, %23 : vector<16x512xf32>
    %28 = arith.select %25, %23, %27 : vector<16x512xi1>, vector<16x512xf32>
    %29 = arith.truncf %28 : vector<16x512xf32> to vector<16x512xbf16>
    %cst_17 = arith.constant dense<0.000000e+00> : vector<16x544xf32>
    %30 = tpu.matmul %29, %3, %cst_17 {dimension_numbers = #tpu.dot_dimension_numbers<[1], [0], [0], [1], [0, 0, 1, 1], [], []>} : vector<16x512xbf16>, vector<512x544xbf16>, vector<16x544xf32> -> vector<16x544xf32>
    %cst_18 = arith.constant 0.000000e+00 : f32
    %31 = vector.broadcast %cst_18 : f32 to vector<16x544xf32>
    %32 = arith.cmpf ogt, %30, %31 : vector<16x544xf32>
    %cst_19 = arith.constant 0.00999999977 : f32
    %33 = vector.broadcast %cst_19 : f32 to vector<16x544xf32>
    %34 = arith.mulf %33, %30 : vector<16x544xf32>
    %35 = arith.select %32, %30, %34 : vector<16x544xi1>, vector<16x544xf32>
    %36 = vector.extract_strided_slice %35 {offsets = [0, 0], sizes = [16, 512], strides = [1, 1]} : vector<16x544xf32> to vector<16x512xf32>
    %37 = vector.extract_strided_slice %35 {offsets = [0, 512], sizes = [16, 32], strides = [1, 1]} : vector<16x544xf32> to vector<16x32xf32>
    %38 = vector.extract_strided_slice %4 {offsets = [32, 0], sizes = [32, 32], strides = [1, 1]} : vector<224x32xbf16> to vector<32x32xbf16>
    %39 = arith.truncf %21 : vector<16x32xf32> to vector<16x32xbf16>
    %cst_20 = arith.constant dense<0.000000e+00> : vector<16x32xf32>
    %40 = tpu.matmul %39, %38, %cst_20 {dimension_numbers = #tpu.dot_dimension_numbers<[1], [0], [0], [1], [0, 0, 1, 1], [], []>} : vector<16x32xbf16>, vector<32x32xbf16>, vector<16x32xf32> -> vector<16x32xf32>
    %41 = vector.extract_strided_slice %4 {offsets = [64, 0], sizes = [32, 32], strides = [1, 1]} : vector<224x32xbf16> to vector<32x32xbf16>
    %42 = arith.truncf %37 : vector<16x32xf32> to vector<16x32xbf16>
    %cst_21 = arith.constant dense<0.000000e+00> : vector<16x32xf32>
    %43 = tpu.matmul %42, %41, %cst_21 {dimension_numbers = #tpu.dot_dimension_numbers<[1], [0], [0], [1], [0, 0, 1, 1], [], []>} : vector<16x32xbf16>, vector<32x32xbf16>, vector<16x32xf32> -> vector<16x32xf32>
    %44 = arith.addf %40, %43 : vector<16x32xf32>
    %cst_22 = arith.constant 0.000000e+00 : f32
    %45 = vector.broadcast %cst_22 : f32 to vector<16x32xf32>
    %46 = arith.cmpf ogt, %44, %45 : vector<16x32xf32>
    %cst_23 = arith.constant 0.00999999977 : f32
    %47 = vector.broadcast %cst_23 : f32 to vector<16x32xf32>
    %48 = arith.mulf %47, %44 : vector<16x32xf32>
    %49 = arith.select %46, %44, %48 : vector<16x32xi1>, vector<16x32xf32>
    %50 = vector.extract_strided_slice %4 {offsets = [96, 0], sizes = [32, 32], strides = [1, 1]} : vector<224x32xbf16> to vector<32x32xbf16>
    %51 = arith.truncf %49 : vector<16x32xf32> to vector<16x32xbf16>
    %cst_24 = arith.constant dense<0.000000e+00> : vector<16x32xf32>
    %52 = tpu.matmul %51, %50, %cst_24 {dimension_numbers = #tpu.dot_dimension_numbers<[1], [0], [0], [1], [0, 0, 1, 1], [], []>} : vector<16x32xbf16>, vector<32x32xbf16>, vector<16x32xf32> -> vector<16x32xf32>
    %cst_25 = arith.constant 0.000000e+00 : f32
    %53 = vector.broadcast %cst_25 : f32 to vector<16x32xf32>
    %54 = arith.cmpf ogt, %52, %53 : vector<16x32xf32>
    %cst_26 = arith.constant 0.00999999977 : f32
    %55 = vector.broadcast %cst_26 : f32 to vector<16x32xf32>
    %56 = arith.mulf %55, %52 : vector<16x32xf32>
    %57 = arith.select %54, %52, %56 : vector<16x32xi1>, vector<16x32xf32>
    %58 = vector.extract_strided_slice %3 {offsets = [0, 512], sizes = [512, 32], strides = [1, 1]} : vector<512x544xbf16> to vector<512x32xbf16>
    %59 = arith.truncf %36 : vector<16x512xf32> to vector<16x512xbf16>
    %cst_27 = arith.constant dense<0.000000e+00> : vector<16x32xf32>
    %60 = tpu.matmul %59, %58, %cst_27 {dimension_numbers = #tpu.dot_dimension_numbers<[1], [0], [0], [1], [0, 0, 1, 1], [], []>} : vector<16x512xbf16>, vector<512x32xbf16>, vector<16x32xf32> -> vector<16x32xf32>
    %cst_28 = arith.constant 0.000000e+00 : f32
    %61 = vector.broadcast %cst_28 : f32 to vector<16x32xf32>
    %62 = arith.cmpf ogt, %60, %61 : vector<16x32xf32>
    %cst_29 = arith.constant 0.00999999977 : f32
    %63 = vector.broadcast %cst_29 : f32 to vector<16x32xf32>
    %64 = arith.mulf %63, %60 : vector<16x32xf32>
    %65 = arith.select %62, %60, %64 : vector<16x32xi1>, vector<16x32xf32>
    %66 = vector.extract_strided_slice %4 {offsets = [32, 0], sizes = [32, 32], strides = [1, 1]} : vector<224x32xbf16> to vector<32x32xbf16>
    %67 = arith.truncf %57 : vector<16x32xf32> to vector<16x32xbf16>
    %cst_30 = arith.constant dense<0.000000e+00> : vector<16x32xf32>
    %68 = tpu.matmul %67, %66, %cst_30 {dimension_numbers = #tpu.dot_dimension_numbers<[1], [0], [0], [1], [0, 0, 1, 1], [], []>} : vector<16x32xbf16>, vector<32x32xbf16>, vector<16x32xf32> -> vector<16x32xf32>
    %69 = vector.extract_strided_slice %4 {offsets = [64, 0], sizes = [32, 32], strides = [1, 1]} : vector<224x32xbf16> to vector<32x32xbf16>
    %70 = arith.truncf %65 : vector<16x32xf32> to vector<16x32xbf16>
    %cst_31 = arith.constant dense<0.000000e+00> : vector<16x32xf32>
    %71 = tpu.matmul %70, %69, %cst_31 {dimension_numbers = #tpu.dot_dimension_numbers<[1], [0], [0], [1], [0, 0, 1, 1], [], []>} : vector<16x32xbf16>, vector<32x32xbf16>, vector<16x32xf32> -> vector<16x32xf32>
    %72 = arith.addf %68, %71 : vector<16x32xf32>
    %cst_32 = arith.constant 0.000000e+00 : f32
    %73 = vector.broadcast %cst_32 : f32 to vector<16x32xf32>
    %74 = arith.cmpf ogt, %72, %73 : vector<16x32xf32>
    %cst_33 = arith.constant 0.00999999977 : f32
    %75 = vector.broadcast %cst_33 : f32 to vector<16x32xf32>
    %76 = arith.mulf %75, %72 : vector<16x32xf32>
    %77 = arith.select %74, %72, %76 : vector<16x32xi1>, vector<16x32xf32>
    %78 = vector.extract_strided_slice %4 {offsets = [96, 0], sizes = [32, 32], strides = [1, 1]} : vector<224x32xbf16> to vector<32x32xbf16>
    %79 = arith.truncf %77 : vector<16x32xf32> to vector<16x32xbf16>
    %cst_34 = arith.constant dense<0.000000e+00> : vector<16x32xf32>
    %80 = tpu.matmul %79, %78, %cst_34 {dimension_numbers = #tpu.dot_dimension_numbers<[1], [0], [0], [1], [0, 0, 1, 1], [], []>} : vector<16x32xbf16>, vector<32x32xbf16>, vector<16x32xf32> -> vector<16x32xf32>
    %cst_35 = arith.constant 0.000000e+00 : f32
    %81 = vector.broadcast %cst_35 : f32 to vector<16x32xf32>
    %82 = arith.cmpf ogt, %80, %81 : vector<16x32xf32>
    %cst_36 = arith.constant 0.00999999977 : f32
    %83 = vector.broadcast %cst_36 : f32 to vector<16x32xf32>
    %84 = arith.mulf %83, %80 : vector<16x32xf32>
    %85 = arith.select %82, %80, %84 : vector<16x32xi1>, vector<16x32xf32>
    %86 = vector.extract_strided_slice %4 {offsets = [128, 0], sizes = [32, 32], strides = [1, 1]} : vector<224x32xbf16> to vector<32x32xbf16>
    %87 = arith.truncf %85 : vector<16x32xf32> to vector<16x32xbf16>
    %cst_37 = arith.constant dense<0.000000e+00> : vector<16x32xf32>
    %88 = tpu.matmul %87, %86, %cst_37 {dimension_numbers = #tpu.dot_dimension_numbers<[1], [0], [0], [1], [0, 0, 1, 1], [], []>} : vector<16x32xbf16>, vector<32x32xbf16>, vector<16x32xf32> -> vector<16x32xf32>
    %cst_38 = arith.constant 0.000000e+00 : f32
    %89 = vector.broadcast %cst_38 : f32 to vector<16x32xf32>
    %90 = arith.cmpf ogt, %88, %89 : vector<16x32xf32>
    %cst_39 = arith.constant 0.00999999977 : f32
    %91 = vector.broadcast %cst_39 : f32 to vector<16x32xf32>
    %92 = arith.mulf %91, %88 : vector<16x32xf32>
    %93 = arith.select %90, %88, %92 : vector<16x32xi1>, vector<16x32xf32>
    %94 = arith.addf %93, %85 : vector<16x32xf32>
    %95 = vector.extract_strided_slice %4 {offsets = [160, 0], sizes = [32, 32], strides = [1, 1]} : vector<224x32xbf16> to vector<32x32xbf16>
    %96 = arith.truncf %94 : vector<16x32xf32> to vector<16x32xbf16>
    %cst_40 = arith.constant dense<0.000000e+00> : vector<16x32xf32>
    %97 = tpu.matmul %96, %95, %cst_40 {dimension_numbers = #tpu.dot_dimension_numbers<[1], [0], [0], [1], [0, 0, 1, 1], [], []>} : vector<16x32xbf16>, vector<32x32xbf16>, vector<16x32xf32> -> vector<16x32xf32>
    %cst_41 = arith.constant 0.000000e+00 : f32
    %98 = vector.broadcast %cst_41 : f32 to vector<16x32xf32>
    %99 = arith.cmpf ogt, %97, %98 : vector<16x32xf32>
    %cst_42 = arith.constant 0.00999999977 : f32
    %100 = vector.broadcast %cst_42 : f32 to vector<16x32xf32>
    %101 = arith.mulf %100, %97 : vector<16x32xf32>
    %102 = arith.select %99, %97, %101 : vector<16x32xi1>, vector<16x32xf32>
    %103 = arith.addf %102, %94 : vector<16x32xf32>
    %104 = vector.extract_strided_slice %4 {offsets = [192, 0], sizes = [32, 32], strides = [1, 1]} : vector<224x32xbf16> to vector<32x32xbf16>
    %105 = arith.truncf %103 : vector<16x32xf32> to vector<16x32xbf16>
    %cst_43 = arith.constant dense<0.000000e+00> : vector<16x32xf32>
    %106 = tpu.matmul %105, %104, %cst_43 {dimension_numbers = #tpu.dot_dimension_numbers<[1], [0], [0], [1], [0, 0, 1, 1], [], []>} : vector<16x32xbf16>, vector<32x32xbf16>, vector<16x32xf32> -> vector<16x32xf32>
    %107 = tpu.iota {dimensions = array<i32: 1>} : vector<16x32xi32>
    %c5_i32 = arith.constant 5 : i32
    %108 = vector.broadcast %c5_i32 : i32 to vector<16x32xi32>
    %109 = arith.cmpi slt, %107, %108 : vector<16x32xi32>
    %cst_44 = arith.constant -1.000000e+30 : f32
    %110 = vector.broadcast %cst_44 : f32 to vector<16x32xf32>
    %111 = arith.select %109, %106, %110 : vector<16x32xi1>, vector<16x32xf32>
    %cst_45 = arith.constant dense<0xFF800000> : vector<16xf32>
    %112 = vector.multi_reduction <maximumf>, %111, %cst_45 [1] : vector<16x32xf32> to vector<16xf32>
    %113 = vector.shape_cast %112 : vector<16xf32> to vector<16x1xf32>
    %114 = vector.broadcast %113 : vector<16x1xf32> to vector<16x32xf32>
    %115 = arith.subf %111, %114 : vector<16x32xf32>
    %116 = math.exp %115 : vector<16x32xf32>
    %cst_46 = arith.constant dense<0.000000e+00> : vector<16xf32>
    %117 = vector.multi_reduction <add>, %116, %cst_46 [1] : vector<16x32xf32> to vector<16xf32>
    %118 = vector.shape_cast %117 : vector<16xf32> to vector<16x1xf32>
    %119 = vector.broadcast %118 : vector<16x1xf32> to vector<16x32xf32>
    %120 = arith.divf %116, %119 : vector<16x32xf32>
    %c0_47 = arith.constant 0 : index
    %c0_48 = arith.constant 0 : index
    %121 = vector.load %arg6[%c0_47, %c0_48] : memref<16x32xf32, #tpu.memory_space<vmem>>, vector<16x32xf32>
    tpu.vector_store %arg6[%c0_47, %c0_48], %120 {strides = array<i32>} : memref<16x32xf32, #tpu.memory_space<vmem>>, vector<16x32xf32>,
    return
  }
  func.func @transform_0(%arg0: i32) -> (i32, i32) {
    %c0_i32 = arith.constant 0 : i32
    %c0_i32_0 = arith.constant 0 : i32
    return %arg0, %c0_i32 : i32, i32
  }
  func.func @transform_1(%arg0: i32) -> (i32, i32) {
    %c0_i32 = arith.constant 0 : i32
    %c0_i32_0 = arith.constant 0 : i32
    %c0_i32_1 = arith.constant 0 : i32
    return %c0_i32, %c0_i32_0 : i32, i32
  }
  func.func @transform_2(%arg0: i32) -> (i32, i32) {
    %c0_i32 = arith.constant 0 : i32
    %c0_i32_0 = arith.constant 0 : i32
    %c0_i32_1 = arith.constant 0 : i32
    return %c0_i32, %c0_i32_0 : i32, i32
  }
  func.func @transform_3(%arg0: i32) -> (i32, i32) {
    %c0_i32 = arith.constant 0 : i32
    %c0_i32_0 = arith.constant 0 : i32
    %c0_i32_1 = arith.constant 0 : i32
    return %c0_i32, %c0_i32_0 : i32, i32
  }
  func.func @transform_4(%arg0: i32) -> (i32, i32) {
    %c0_i32 = arith.constant 0 : i32
    %c0_i32_0 = arith.constant 0 : i32
    %c0_i32_1 = arith.constant 0 : i32
    return %c0_i32, %c0_i32_0 : i32, i32
  }
  func.func @transform_5(%arg0: i32) -> (i32, i32) {
    %c0_i32 = arith.constant 0 : i32
    %c0_i32_0 = arith.constant 0 : i32
    return %arg0, %c0_i32 : i32, i32
  }
}

</mosaic_0001>

<bundles_post_ra>
// kernel: tpu_custom_call.1
= control target key start
LH: loop header
LB: loop body
LE: loop exit
PB: predicated region body
PF: predicated region fallthrough
CT: control target
= control target key end

     0   :  { %v4243_v2 = vmov 0   ;;  %vm405_vm0 = vcmask 130048   ;;  %v4244_v8 = vmov 0.0   ;;  %vm4245_vm1 = vmmov 0   ;;  %s5466_s0 = inlined_call_operand.vmem [shape: f32[16,16], index: 0, kind: input, shape index: {}]   ;;  %s5467_s1 = inlined_call_operand.vmem [shape: bf16[16,544], index: 1, kind: input, shape index: {}]   ;;  %s5468_s2 = inlined_call_operand.vmem [shape: bf16[512,512], index: 2, kind: input, shape index: {}]   ;;  %s5469_s3 = inlined_call_operand.vmem [shape: bf16[512,544], index: 3, kind: input, shape index: {}]   ;;  %s5470_s4 = inlined_call_operand.vmem [shape: bf16[224,32], index: 4, kind: input, shape index: {}]   ;;  %s5471_s5 = inlined_call_operand.hbm [shape: f32[16,32], index: 5, kind: output, shape index: {}]  }
   0x1   :  { %v3776_v0 = vld [vmem:[%s5467_s1 + $0x4] ss:$20 sps:$4 sm:$0xff]   ;;  %v3778_v1 = vld [vmem:[%s5467_s1] ss:$20 sps:$4 sm:$0xff]   ;;  %441 = vmatprep.mubr.bf16.mxu0 %v4243_v2  ;;  %v23_v4 = vld [vmem:[%s5466_s0 + $0x8] sm:$0xff]  ;;  %484 = vmatprep.mubr.bf16.mxu1 %v4243_v2 }
   0x2   :  { %v22_v3 = vld [vmem:[%s5466_s0] sm:$0xff]  ;;  %423 = vmatprep.subr.bf16.mxu0 %v3776_v0  ;;  %v3782_v9 = vld [vmem:[%s5467_s1 + $0x8] ss:$20 sps:$4 sm:$0xff]  }
   0x3   :  { %v378_v5 = vpack.c.bf16 %v23_v4, %v22_v3  ;;  %v3779_v6 = vld [vmem:[%s5467_s1 + $0x10] ss:$20 sps:$4 sm:$0xff]   ;;  %424 = vmatpush1.bf16.msra.mxu0 %v3778_v1  ;;  %v3780_v7 = vld [vmem:[%s5467_s1 + $0xc] ss:$20 sps:$4 sm:$0xff]  }
   0x4   :  { %3684 = vmatprep.subr.bf16.mxu0 %v4244_v8  ;;  %466 = vmatprep.subr.bf16.mxu1 %v3780_v7  ;;  %v3785_v10 = vld [vmem:[%s5468_s2 + $0xe4] ss:$16 sps:$4 sm:$0xff]   ;;  %v3783_v11 = vld [vmem:[%s5468_s2 + $0xe0] ss:$16 sps:$4 sm:$0xff]   ;;  %v3831_v42 = vld [vmem:[%s5470_s4 + $0x8] sm:$0xff]  }
   0x5   :  { %467 = vmatpush1.bf16.msra.mxu1 %v3782_v9  ;;  %v3788_v12 = vld [vmem:[%s5468_s2 + $0xc4] ss:$16 sps:$4 sm:$0xff]   ;;  %v3786_v13 = vld [vmem:[%s5468_s2 + $0xc0] ss:$16 sps:$4 sm:$0xff]   ;;  %v3834_v43 = vld [vmem:[%s5468_s2 + $0xec] ss:$16 sps:$4 sm:$0xff]  }
   0x6   :  { %3249 = vmatmul.mubr.msk.bf16.vlgmr.msra.gmra.mxu0 %vm405_vm0, %v378_v5  ;;  %3690 = vmatprep.subr.bf16.mxu1 %v4244_v8  ;;  %v3791_v14 = vld [vmem:[%s5468_s2 + $0xa4] ss:$16 sps:$4 sm:$0xff]   ;;  %v3789_v15 = vld [vmem:[%s5468_s2 + $0xa0] ss:$16 sps:$4 sm:$0xff]  }
   0x7   :  { %3685 = vmatpush3.bf16.msra.mxu0 %v3779_v6  ;;  %3686 = vmatprep.mubr.msk.bf16.mxu0 %vm4245_vm1, %v4244_v8  ;;  %v3794_v16 = vld [vmem:[%s5468_s2 + $0x84] ss:$16 sps:$4 sm:$0xff]   ;;  %v3792_v17 = vld [vmem:[%s5468_s2 + $0x80] ss:$16 sps:$4 sm:$0xff]  }
   0x8   :  { %1274 = vmatprep.subr.bf16.mxu0 %v3785_v10  ;;  %3250 = vmatmul.mubr.msk.bf16.vlgmr.msra.gmra.mxu1 %vm405_vm0, %v378_v5  ;;  %v3797_v18 = vld [vmem:[%s5468_s2 + $0x64] ss:$16 sps:$4 sm:$0xff]   ;;  %v3795_v19 = vld [vmem:[%s5468_s2 + $0x60] ss:$16 sps:$4 sm:$0xff]  }
   0x9   :  { %3694 = vmatprep.mubr.msk.bf16.mxu1 %vm4245_vm1, %v4244_v8  ;;  %v3800_v20 = vld [vmem:[%s5468_s2 + $0x44] ss:$16 sps:$4 sm:$0xff]   ;;  %v3798_v21 = vld [vmem:[%s5468_s2 + $0x40] ss:$16 sps:$4 sm:$0xff]   ;;  %3691 = vmatpush3.bf16.msra.mxu1 %v3831_v42 }
   0xa   :  { %v3803_v22 = vld [vmem:[%s5468_s2 + $0x24] ss:$16 sps:$4 sm:$0xff]   ;;  %v3801_v23 = vld [vmem:[%s5468_s2 + $0x20] ss:$16 sps:$4 sm:$0xff]   ;;  %3692 = vmatprep.subr.bf16.mxu1 %v4244_v8 }
   0xb   :  { %v3806_v24 = vld [vmem:[%s5468_s2 + $0x4] ss:$16 sps:$4 sm:$0xff]   ;;  %v3804_v25 = vld [vmem:[%s5468_s2] ss:$16 sps:$4 sm:$0xff]  }
   0xc   :  { %v3809_v26 = vld [vmem:[%s5468_s2 + $0x1e4] ss:$16 sps:$4 sm:$0xff]   ;;  %v3807_v27 = vld [vmem:[%s5468_s2 + $0x1e0] ss:$16 sps:$4 sm:$0xff]  }
   0xd   :  { %v3812_v28 = vld [vmem:[%s5468_s2 + $0x1c4] ss:$16 sps:$4 sm:$0xff]   ;;  %v3810_v29 = vld [vmem:[%s5468_s2 + $0x1c0] ss:$16 sps:$4 sm:$0xff]  }
   0xe   :  { %3687 = vmatmul.mubr.msk.bf16.vlgmr.msra.gmra.mxu0 %vm405_vm0, %v378_v5  ;;  %v3815_v30 = vld [vmem:[%s5468_s2 + $0x1a4] ss:$16 sps:$4 sm:$0xff]   ;;  %v3813_v31 = vld [vmem:[%s5468_s2 + $0x1a0] ss:$16 sps:$4 sm:$0xff]  }
   0xf   :  { %1275 = vmatpush1.bf16.msra.mxu0 %v3783_v11  ;;  %v3818_v32 = vld [vmem:[%s5468_s2 + $0x184] ss:$16 sps:$4 sm:$0xff]   ;;  %v3816_v33 = vld [vmem:[%s5468_s2 + $0x180] ss:$16 sps:$4 sm:$0xff]  }
  0x10   :  { %1276 = vmatprep.subr.bf16.mxu0 %v3788_v12  ;;  %v3821_v34 = vld [vmem:[%s5468_s2 + $0x164] ss:$16 sps:$4 sm:$0xff]   ;;  %v3819_v35 = vld [vmem:[%s5468_s2 + $0x160] ss:$16 sps:$4 sm:$0xff]  }
  0x11   :  { %v3824_v36 = vld [vmem:[%s5468_s2 + $0x144] ss:$16 sps:$4 sm:$0xff]   ;;  %v3822_v37 = vld [vmem:[%s5468_s2 + $0x140] ss:$16 sps:$4 sm:$0xff]  }
  0x12   :  { %v3827_v38 = vld [vmem:[%s5468_s2 + $0x124] ss:$16 sps:$4 sm:$0xff]   ;;  %v3825_v39 = vld [vmem:[%s5468_s2 + $0x120] ss:$16 sps:$4 sm:$0xff]  }
  0x13   :  { %1277 = vmatpush1.bf16.msra.mxu0 %v3786_v13  ;;  %v3830_v40 = vld [vmem:[%s5468_s2 + $0x104] ss:$16 sps:$4 sm:$0xff]   ;;  %v3828_v41 = vld [vmem:[%s5468_s2 + $0x100] ss:$16 sps:$4 sm:$0xff]  }
  0x14   :  { %1278 = vmatprep.subr.bf16.mxu0 %v3791_v14  ;;  %v3835_v44 = vld [vmem:[%s5470_s4] sm:$0xff]  }
  0x15   :  { %3693 = vmatpush3.bf16.msra.mxu1 %v3835_v44  ;;  %v3841_v45 = vld [vmem:[%s5468_s2 + $0x2e4] ss:$16 sps:$4 sm:$0xff]  }
  0x16   :  { %1317 = vmatprep.subr.bf16.mxu1 %v3841_v45 }
  0x17   :  { %1279 = vmatpush1.bf16.msra.mxu0 %v3789_v15 }
  0x18   :  { %1280 = vmatprep.subr.bf16.mxu0 %v3794_v16 }
  0x1b   :  { %1281 = vmatpush1.bf16.msra.mxu0 %v3792_v17 }
  0x1c   :  { %1282 = vmatprep.subr.bf16.mxu0 %v3797_v18 }
  0x1f   :  { %1283 = vmatpush1.bf16.msra.mxu0 %v3795_v19 }
  0x20   :  { %1284 = vmatprep.subr.bf16.mxu0 %v3800_v20 }
  0x23   :  { %1285 = vmatpush1.bf16.msra.mxu0 %v3798_v21 }
  0x24   :  { %1286 = vmatprep.subr.bf16.mxu0 %v3803_v22 }
  0x27   :  { %1287 = vmatpush1.bf16.msra.mxu0 %v3801_v23 }
  0x28   :  { %1288 = vmatprep.subr.bf16.mxu0 %v3806_v24 }
  0x2b   :  { %1289 = vmatpush1.bf16.msra.mxu0 %v3804_v25 }
  0x2c   :  { %1290 = vmatprep.subr.bf16.mxu0 %v3809_v26 }
  0x2f   :  { %1291 = vmatpush2.bf16.msra.mxu0 %v3807_v27 }
  0x30   :  { %1292 = vmatprep.subr.bf16.mxu0 %v3812_v28 }
  0x33   :  { %1293 = vmatpush2.bf16.msra.mxu0 %v3810_v29 }
  0x34   :  { %1294 = vmatprep.subr.bf16.mxu0 %v3815_v30 }
  0x37   :  { %1295 = vmatpush2.bf16.msra.mxu0 %v3813_v31 }
  0x38   :  { %1296 = vmatprep.subr.bf16.mxu0 %v3818_v32 }
  0x3b   :  { %1297 = vmatpush2.bf16.msra.mxu0 %v3816_v33 }
  0x3c   :  { %1298 = vmatprep.subr.bf16.mxu0 %v3821_v34 }
  0x3f   :  { %1299 = vmatpush2.bf16.msra.mxu0 %v3819_v35 }
  0x40   :  { %1300 = vmatprep.subr.bf16.mxu0 %v3824_v36 }
  0x43   :  { %1301 = vmatpush2.bf16.msra.mxu0 %v3822_v37 }
  0x44   :  { %1302 = vmatprep.subr.bf16.mxu0 %v3827_v38 }
  0x47   :  { %1303 = vmatpush2.bf16.msra.mxu0 %v3825_v39 }
  0x48   :  { %1304 = vmatprep.subr.bf16.mxu0 %v3830_v40 }
  0x4b   :  { %1305 = vmatpush2.bf16.msra.mxu0 %v3828_v41 }
  0x4c   :  { %1360 = vmatprep.subr.bf16.mxu0 %v3834_v43 }
  0x4d   :  { %10 = vsyncpa [#allocation3], 0  ;;  %v3832_v5 = vld [vmem:[%s5468_s2 + $0xe8] ss:$16 sps:$4 sm:$0xff]   ;;  %v3838_v11 = vld [vmem:[%s5468_s2 + $0xcc] ss:$16 sps:$4 sm:$0xff]  }
  0x4e   :  { %v3836_v18 = vld [vmem:[%s5468_s2 + $0xc8] ss:$16 sps:$4 sm:$0xff]   ;;  %v3839_v21 = vld [vmem:[%s5468_s2 + $0x2e0] ss:$16 sps:$4 sm:$0xff]   ;;  %vm579_vm12 = vcmask 261120  }
  0x4f   :  { %v3844_v22 = vld [vmem:[%s5468_s2 + $0xac] ss:$16 sps:$4 sm:$0xff]   ;;  %v3847_v24 = vld [vmem:[%s5468_s2 + $0x2c4] ss:$16 sps:$4 sm:$0xff]   ;;  %v3842_v26 = vld [vmem:[%s5468_s2 + $0xa8] ss:$16 sps:$4 sm:$0xff]  }
  0x50   :  { %v3845_v27 = vld [vmem:[%s5468_s2 + $0x2c0] ss:$16 sps:$4 sm:$0xff]   ;;  %v3850_v28 = vld [vmem:[%s5468_s2 + $0x8c] ss:$16 sps:$4 sm:$0xff]   ;;  %v3853_v29 = vld [vmem:[%s5468_s2 + $0x2a4] ss:$16 sps:$4 sm:$0xff]  }
  0x51   :  { %v3848_v30 = vld [vmem:[%s5468_s2 + $0x88] ss:$16 sps:$4 sm:$0xff]   ;;  %v3851_v31 = vld [vmem:[%s5468_s2 + $0x2a0] ss:$16 sps:$4 sm:$0xff]   ;;  %v3856_v32 = vld [vmem:[%s5468_s2 + $0x6c] ss:$16 sps:$4 sm:$0xff]  }
  0x52   :  { %v3859_v33 = vld [vmem:[%s5468_s2 + $0x284] ss:$16 sps:$4 sm:$0xff]   ;;  %v3854_v34 = vld [vmem:[%s5468_s2 + $0x68] ss:$16 sps:$4 sm:$0xff]   ;;  %v3857_v35 = vld [vmem:[%s5468_s2 + $0x280] ss:$16 sps:$4 sm:$0xff]  }
  0x53   :  { %v3862_v36 = vld [vmem:[%s5468_s2 + $0x4c] ss:$16 sps:$4 sm:$0xff]   ;;  %v3865_v37 = vld [vmem:[%s5468_s2 + $0x264] ss:$16 sps:$4 sm:$0xff]   ;;  %v3860_v38 = vld [vmem:[%s5468_s2 + $0x48] ss:$16 sps:$4 sm:$0xff]  }
  0x54   :  { %v3863_v39 = vld [vmem:[%s5468_s2 + $0x260] ss:$16 sps:$4 sm:$0xff]   ;;  %v3868_v40 = vld [vmem:[%s5468_s2 + $0x2c] ss:$16 sps:$4 sm:$0xff]   ;;  %v3871_v41 = vld [vmem:[%s5468_s2 + $0x244] ss:$16 sps:$4 sm:$0xff]  }
  0x55   :  { %v3866_v42 = vld [vmem:[%s5468_s2 + $0x28] ss:$16 sps:$4 sm:$0xff]   ;;  %v3869_v43 = vld [vmem:[%s5468_s2 + $0x240] ss:$16 sps:$4 sm:$0xff]   ;;  %v3874_v44 = vld [vmem:[%s5468_s2 + $0xc] ss:$16 sps:$4 sm:$0xff]  }
  0x56   :  { %v3877_v45 = vld [vmem:[%s5468_s2 + $0x224] ss:$16 sps:$4 sm:$0xff]  }
  0xc6   :  { %v443_v46 = vpop.f32.mrf.mxu0 }
  0xc7   :  { %v546_v48 = vmul.f32 0.01, %v443_v46  ;;  %vm536_vm2 = vcmp.gt.f32.partialorder %v443_v46, 0.0 }
  0xc8   :  { %v445_v47 = vpop.f32.mrf.mxu0  ;;  %v486_v49 = vpop.f32.mrf.mxu1 }
  0xc9   :  { %v548_v51 = vmul.f32 0.01, %v486_v49  ;;  %v547_v52 = vmul.f32 0.01, %v445_v47  ;;  %vm538_vm4 = vcmp.gt.f32.partialorder %v486_v49, 0.0  ;;  %vm537_vm5 = vcmp.gt.f32.partialorder %v445_v47, 0.0 }
  0xca   :  { %v447_v50 = vpop.f32.mrf.mxu0  ;;  %v488_v54 = vpop.f32.mrf.mxu1  ;;  %v556_v56 = vsel %vm536_vm2, %v443_v46, %v546_v48  ;;  %v3872_v46 = vld [vmem:[%s5468_s2 + $0x8] ss:$16 sps:$4 sm:$0xff]   ;;  %v3880_v48 = vld [vmem:[%s5468_s2 + $0x1ec] ss:$16 sps:$4 sm:$0xff]  }
  0xcb   :  { %vm541_vm3 = vcmp.gt.f32.partialorder %v447_v50, 0.0  ;;  %v551_v53 = vmul.f32 0.01, %v447_v50  ;;  %v558_v61 = vsel %vm538_vm4, %v486_v49, %v548_v51  ;;  %v557_v63 = vsel %vm537_vm5, %v445_v47, %v547_v52  ;;  %v3875_v47 = vld [vmem:[%s5468_s2 + $0x220] ss:$16 sps:$4 sm:$0xff]  }
  0xcc   :  { %v449_v55 = vpop.f32.mrf.mxu0  ;;  %v490_v58 = vpop.f32.mrf.mxu1  ;;  %vm539_vm8 = vcmp.gt.f32.partialorder %v488_v54, 0.0  ;;  %v549_v1 = vmul.f32 0.01, %v488_v54  ;;  %v3883_v49 = vld [vmem:[%s5468_s2 + $0x204] ss:$16 sps:$4 sm:$0xff]  }
  0xcd   :  { %vm542_vm6 = vcmp.gt.f32.partialorder %v449_v55, 0.0  ;;  %v552_v57 = vmul.f32 0.01, %v449_v55  ;;  %v561_v59 = vsel %vm541_vm3, %v447_v50, %v551_v53  ;;  %vm543_vm7 = vcmp.gt.f32.partialorder %v490_v58, 0.0  ;;  %v3878_v50 = vld [vmem:[%s5468_s2 + $0x1e8] ss:$16 sps:$4 sm:$0xff]  }
  0xce   :  { %v529_v60 = vpop.f32.mrf.mxu0  ;;  %v553_v62 = vmul.f32 0.01, %v490_v58  ;;  %v492_v2 = vpop.f32.mrf.mxu1  ;;  %v4421_v9 = vpack.c.bf16 %v561_v59, %v556_v56  ;;  %v559_v15 = vsel %vm539_vm8, %v488_v54, %v549_v1  ;;  %v3881_v51 = vld [vmem:[%s5468_s2 + $0x200] ss:$16 sps:$4 sm:$0xff]   ;;  %v3886_v52 = vld [vmem:[%s5468_s2 + $0x1cc] ss:$16 sps:$4 sm:$0xff]  }
  0xcf   :  { %v562_v0 = vsel %vm542_vm6, %v449_v55, %v552_v57  ;;  %vm544_vm9 = vcmp.gt.f32.partialorder %v492_v2, 0.0  ;;  %v554_v7 = vmul.f32 0.01, %v492_v2  ;;  %v550_v10 = vmul.f32 0.01, %v529_v60 }
  0xd0   :  { %v3688_v3 = vpop.f32.mrf.mxu0  ;;  %v631_v4 = vpack.c.bf16 %v562_v0, %v557_v63  ;;  %v563_v6 = vsel %vm543_vm7, %v490_v58, %v553_v62  ;;  %vm540_vm10 = vcmp.gt.f32.partialorder %v529_v60, 0.0  ;;  %v3889_v53 = vld [vmem:[%s5468_s2 + $0x3e4] ss:$16 sps:$4 sm:$0xff]   ;;  %v3884_v54 = vld [vmem:[%s5468_s2 + $0x1c8] ss:$16 sps:$4 sm:$0xff]  }
  0xd1   :  { %v4426_v12 = vpack.c.bf16 %v563_v6, %v558_v61  ;;  %v564_v16 = vsel %vm544_vm9, %v492_v2, %v554_v7  ;;  %v560_v19 = vsel %vm540_vm10, %v529_v60, %v550_v10  ;;  %v3887_v55 = vld [vmem:[%s5468_s2 + $0x3e0] ss:$16 sps:$4 sm:$0xff]   ;;  %v3892_v56 = vld [vmem:[%s5468_s2 + $0x1ac] ss:$16 sps:$4 sm:$0xff]   ;;  %v3895_v57 = vld [vmem:[%s5468_s2 + $0x3c4] ss:$16 sps:$4 sm:$0xff]  }
  0xd2   :  { %v532_v13 = vpop.f32.mrf.mxu0  ;;  %1306 = vmatprep.mubr.bf16.mxu0 %v631_v4  ;;  %v4442_v25 = vpack.c.bf16 %v564_v16, %v559_v15  ;;  %v3890_v58 = vld [vmem:[%s5468_s2 + $0x1a8] ss:$16 sps:$4 sm:$0xff]   ;;  %v3893_v59 = vld [vmem:[%s5468_s2 + $0x3c0] ss:$16 sps:$4 sm:$0xff]   ;;  %v3898_v60 = vld [vmem:[%s5468_s2 + $0x18c] ss:$16 sps:$4 sm:$0xff]  }
  0xd3   :  { %vm545_vm11 = vcmp.gt.f32.partialorder %v532_v13, 0.0  ;;  %v555_v14 = vmul.f32 0.01, %v532_v13  ;;  %1307 = vmatmul.mubr.bf16.vlgmr.msra.gmra.mxu0 %v4421_v9  ;;  %v3901_v61 = vld [vmem:[%s5468_s2 + $0x3a4] ss:$16 sps:$4 sm:$0xff]  }
  0xd4   :  { %1361 = vmatpush1.bf16.msra.mxu0 %v3832_v5  ;;  %v3689_v17 = vpop.f32.mrf.mxu0  ;;  %1392 = vmatprep.mubr.bf16.mxu0 %v631_v4  ;;  %v3896_v62 = vld [vmem:[%s5468_s2 + $0x188] ss:$16 sps:$4 sm:$0xff]   ;;  %v3899_v63 = vld [vmem:[%s5468_s2 + $0x3a0] ss:$16 sps:$4 sm:$0xff]   ;;  %v3904_v0 = vld [vmem:[%s5468_s2 + $0x16c] ss:$16 sps:$4 sm:$0xff]  }
  0xd5   :  { %v565_v20 = vsel %vm545_vm11, %v532_v13, %v555_v14  ;;  %1362 = vmatprep.subr.bf16.mxu0 %v3838_v11  ;;  %v3907_v1 = vld [vmem:[%s5468_s2 + $0x384] ss:$16 sps:$4 sm:$0xff]   ;;  %v3902_v2 = vld [vmem:[%s5468_s2 + $0x168] ss:$16 sps:$4 sm:$0xff]   ;;  %v3905_v3 = vld [vmem:[%s5468_s2 + $0x380] ss:$16 sps:$4 sm:$0xff]  }
  0xd6   :  { %v566_v23 = vpack.c.bf16 %v565_v20, %v560_v19  ;;  %v3910_v4 = vld [vmem:[%s5468_s2 + $0x14c] ss:$16 sps:$4 sm:$0xff]   ;;  %v3913_v5 = vld [vmem:[%s5468_s2 + $0x364] ss:$16 sps:$4 sm:$0xff]   ;;  %v3908_v6 = vld [vmem:[%s5468_s2 + $0x148] ss:$16 sps:$4 sm:$0xff]  }
  0xd7   :  { %v3911_v7 = vld [vmem:[%s5468_s2 + $0x360] ss:$16 sps:$4 sm:$0xff]   ;;  %v3916_v10 = vld [vmem:[%s5468_s2 + $0x12c] ss:$16 sps:$4 sm:$0xff]   ;;  %v3919_v11 = vld [vmem:[%s5468_s2 + $0x344] ss:$16 sps:$4 sm:$0xff]  }
  0xd8   :  { %1363 = vmatpush1.bf16.msra.mxu0 %v3836_v18  ;;  %3695 = vmatmul.mubr.msk.bf16.vlgmr.msra.gmra.mxu1 %vm579_vm12, %v566_v23  ;;  %v3914_v13 = vld [vmem:[%s5468_s2 + $0x128] ss:$16 sps:$4 sm:$0xff]   ;;  %v3917_v14 = vld [vmem:[%s5468_s2 + $0x340] ss:$16 sps:$4 sm:$0xff]   ;;  %v3922_v15 = vld [vmem:[%s5468_s2 + $0x10c] ss:$16 sps:$4 sm:$0xff]  }
  0xd9   :  { %1318 = vmatpush1.bf16.msra.mxu1 %v3839_v21  ;;  %1364 = vmatprep.subr.bf16.mxu0 %v3844_v22  ;;  %v3925_v16 = vld [vmem:[%s5468_s2 + $0x324] ss:$16 sps:$4 sm:$0xff]   ;;  %v3920_v17 = vld [vmem:[%s5468_s2 + $0x108] ss:$16 sps:$4 sm:$0xff]   ;;  %v3923_v18 = vld [vmem:[%s5468_s2 + $0x320] ss:$16 sps:$4 sm:$0xff]  }
  0xda   :  { %1319 = vmatprep.subr.bf16.mxu1 %v3847_v24  ;;  %1349 = vmatprep.mubr.bf16.mxu1 %v4442_v25  ;;  %v3928_v19 = vld [vmem:[%s5468_s2 + $0x304] ss:$16 sps:$4 sm:$0xff]   ;;  %v3926_v20 = vld [vmem:[%s5468_s2 + $0x300] ss:$16 sps:$4 sm:$0xff]   ;;  %v3931_v21 = vld [vmem:[%s5468_s2 + $0x2ec] ss:$16 sps:$4 sm:$0xff]  }
  0xdb   :  { %v3929_v22 = vld [vmem:[%s5468_s2 + $0x2e8] ss:$16 sps:$4 sm:$0xff]   ;;  %v3934_v23 = vld [vmem:[%s5468_s2 + $0x2cc] ss:$16 sps:$4 sm:$0xff]  }
  0xdc   :  { %1365 = vmatpush1.bf16.msra.mxu0 %v3842_v26  ;;  %v3932_v24 = vld [vmem:[%s5468_s2 + $0x2c8] ss:$16 sps:$4 sm:$0xff]  }
  0xdd   :  { %1320 = vmatpush1.bf16.msra.mxu1 %v3845_v27  ;;  %1366 = vmatprep.subr.bf16.mxu0 %v3850_v28  ;;  %v3935_v26 = vld [vmem:[%s5468_s2 + $0x2a8] ss:$16 sps:$4 sm:$0xff]   ;;  %v3940_v27 = vld [vmem:[%s5468_s2 + $0x28c] ss:$16 sps:$4 sm:$0xff]  }
  0xde   :  { %1321 = vmatprep.subr.bf16.mxu1 %v3853_v29  ;;  %v3979_v28 = vld [vmem:[%s5469_s3 + $0x11c] ss:$20 sps:$4 sm:$0xff]   ;;  %v3938_v29 = vld [vmem:[%s5468_s2 + $0x288] ss:$16 sps:$4 sm:$0xff]  }
  0xe0   :  { %1367 = vmatpush1.bf16.msra.mxu0 %v3848_v30  ;;  %v3982_v30 = vld [vmem:[%s5469_s3 + $0xf4] ss:$20 sps:$4 sm:$0xff]  }
  0xe1   :  { %1322 = vmatpush1.bf16.msra.mxu1 %v3851_v31  ;;  %1368 = vmatprep.subr.bf16.mxu0 %v3856_v32  ;;  %v3943_v31 = vld [vmem:[%s5468_s2 + $0x26c] ss:$16 sps:$4 sm:$0xff]   ;;  %v3980_v32 = vld [vmem:[%s5469_s3 + $0xf0] ss:$20 sps:$4 sm:$0xff]  }
  0xe2   :  { %1323 = vmatprep.subr.bf16.mxu1 %v3859_v33  ;;  %v3985_v33 = vld [vmem:[%s5469_s3 + $0xcc] ss:$20 sps:$4 sm:$0xff]  }
  0xe4   :  { %1369 = vmatpush1.bf16.msra.mxu0 %v3854_v34  ;;  %v3941_v34 = vld [vmem:[%s5468_s2 + $0x268] ss:$16 sps:$4 sm:$0xff]  }
  0xe5   :  { %1324 = vmatpush1.bf16.msra.mxu1 %v3857_v35  ;;  %1370 = vmatprep.subr.bf16.mxu0 %v3862_v36  ;;  %v3946_v35 = vld [vmem:[%s5468_s2 + $0x24c] ss:$16 sps:$4 sm:$0xff]  }
  0xe6   :  { %1325 = vmatprep.subr.bf16.mxu1 %v3865_v37  ;;  %v3983_v36 = vld [vmem:[%s5469_s3 + $0xc8] ss:$20 sps:$4 sm:$0xff]   ;;  %v3988_v37 = vld [vmem:[%s5469_s3 + $0xa4] ss:$20 sps:$4 sm:$0xff]  }
  0xe8   :  { %1371 = vmatpush1.bf16.msra.mxu0 %v3860_v38  ;;  %v3944_v38 = vld [vmem:[%s5468_s2 + $0x248] ss:$16 sps:$4 sm:$0xff]  }
  0xe9   :  { %1326 = vmatpush1.bf16.msra.mxu1 %v3863_v39  ;;  %1372 = vmatprep.subr.bf16.mxu0 %v3868_v40  ;;  %v3949_v39 = vld [vmem:[%s5468_s2 + $0x22c] ss:$16 sps:$4 sm:$0xff]   ;;  %v3986_v40 = vld [vmem:[%s5469_s3 + $0xa0] ss:$20 sps:$4 sm:$0xff]  }
  0xea   :  { %1327 = vmatprep.subr.bf16.mxu1 %v3871_v41  ;;  %v3991_v41 = vld [vmem:[%s5469_s3 + $0x7c] ss:$20 sps:$4 sm:$0xff]  }
  0xec   :  { %1373 = vmatpush1.bf16.msra.mxu0 %v3866_v42  ;;  %v3947_v42 = vld [vmem:[%s5468_s2 + $0x228] ss:$16 sps:$4 sm:$0xff]  }
  0xed   :  { %1328 = vmatpush1.bf16.msra.mxu1 %v3869_v43  ;;  %1374 = vmatprep.subr.bf16.mxu0 %v3874_v44  ;;  %v3952_v43 = vld [vmem:[%s5468_s2 + $0x20c] ss:$16 sps:$4 sm:$0xff]  }
  0xee   :  { %1329 = vmatprep.subr.bf16.mxu1 %v3877_v45  ;;  %v3989_v44 = vld [vmem:[%s5469_s3 + $0x78] ss:$20 sps:$4 sm:$0xff]   ;;  %v3994_v45 = vld [vmem:[%s5469_s3 + $0x54] ss:$20 sps:$4 sm:$0xff]  }
  0xf0   :  { %1375 = vmatpush1.bf16.msra.mxu0 %v3872_v46  ;;  %v3950_v46 = vld [vmem:[%s5468_s2 + $0x208] ss:$16 sps:$4 sm:$0xff]  }
  0xf1   :  { %1330 = vmatpush1.bf16.msra.mxu1 %v3875_v47  ;;  %1376 = vmatprep.subr.bf16.mxu0 %v3880_v48  ;;  %v3955_v47 = vld [vmem:[%s5468_s2 + $0x3ec] ss:$16 sps:$4 sm:$0xff]   ;;  %v3992_v48 = vld [vmem:[%s5469_s3 + $0x50] ss:$20 sps:$4 sm:$0xff]  }
  0xf2   :  { %1331 = vmatprep.subr.bf16.mxu1 %v3883_v49  ;;  %v3997_v49 = vld [vmem:[%s5469_s3 + $0x2c] ss:$20 sps:$4 sm:$0xff]  }
  0xf4   :  { %1377 = vmatpush2.bf16.msra.mxu0 %v3878_v50  ;;  %v3953_v50 = vld [vmem:[%s5468_s2 + $0x3e8] ss:$16 sps:$4 sm:$0xff]  }
  0xf5   :  { %1332 = vmatpush1.bf16.msra.mxu1 %v3881_v51  ;;  %1378 = vmatprep.subr.bf16.mxu0 %v3886_v52  ;;  %v3958_v51 = vld [vmem:[%s5468_s2 + $0x3cc] ss:$16 sps:$4 sm:$0xff]  }
  0xf6   :  { %1333 = vmatprep.subr.bf16.mxu1 %v3889_v53  ;;  %v3995_v52 = vld [vmem:[%s5469_s3 + $0x28] ss:$20 sps:$4 sm:$0xff]   ;;  %v4000_v53 = vld [vmem:[%s5469_s3 + $0x4] ss:$20 sps:$4 sm:$0xff]  }
  0xf8   :  { %1379 = vmatpush2.bf16.msra.mxu0 %v3884_v54  ;;  %v3956_v54 = vld [vmem:[%s5468_s2 + $0x3c8] ss:$16 sps:$4 sm:$0xff]  }
  0xf9   :  { %1334 = vmatpush2.bf16.msra.mxu1 %v3887_v55  ;;  %1380 = vmatprep.subr.bf16.mxu0 %v3892_v56  ;;  %v3961_v55 = vld [vmem:[%s5468_s2 + $0x3ac] ss:$16 sps:$4 sm:$0xff]   ;;  %v3998_v56 = vld [vmem:[%s5469_s3] ss:$20 sps:$4 sm:$0xff]  }
  0xfa   :  { %1335 = vmatprep.subr.bf16.mxu1 %v3895_v57  ;;  %v4003_v57 = vld [vmem:[%s5469_s3 + $0x25c] ss:$20 sps:$4 sm:$0xff]  }
  0xfc   :  { %1381 = vmatpush2.bf16.msra.mxu0 %v3890_v58  ;;  %v3959_v58 = vld [vmem:[%s5468_s2 + $0x3a8] ss:$16 sps:$4 sm:$0xff]  }
  0xfd   :  { %1336 = vmatpush2.bf16.msra.mxu1 %v3893_v59  ;;  %1382 = vmatprep.subr.bf16.mxu0 %v3898_v60  ;;  %v3964_v59 = vld [vmem:[%s5468_s2 + $0x38c] ss:$16 sps:$4 sm:$0xff]  }
  0xfe   :  { %1337 = vmatprep.subr.bf16.mxu1 %v3901_v61  ;;  %v4001_v60 = vld [vmem:[%s5469_s3 + $0x258] ss:$20 sps:$4 sm:$0xff]   ;;  %v4006_v61 = vld [vmem:[%s5469_s3 + $0x234] ss:$20 sps:$4 sm:$0xff]  }
 0x100   :  { %1383 = vmatpush2.bf16.msra.mxu0 %v3896_v62  ;;  %v3962_v62 = vld [vmem:[%s5468_s2 + $0x388] ss:$16 sps:$4 sm:$0xff]  }
 0x101   :  { %1338 = vmatpush2.bf16.msra.mxu1 %v3899_v63  ;;  %1384 = vmatprep.subr.bf16.mxu0 %v3904_v0  ;;  %v3967_v63 = vld [vmem:[%s5468_s2 + $0x36c] ss:$16 sps:$4 sm:$0xff]   ;;  %v4004_v0 = vld [vmem:[%s5469_s3 + $0x230] ss:$20 sps:$4 sm:$0xff]  }
 0x102   :  { %1339 = vmatprep.subr.bf16.mxu1 %v3907_v1  ;;  %v4009_v1 = vld [vmem:[%s5469_s3 + $0x20c] ss:$20 sps:$4 sm:$0xff]  }
 0x104   :  { %1385 = vmatpush2.bf16.msra.mxu0 %v3902_v2  ;;  %v3965_v2 = vld [vmem:[%s5468_s2 + $0x368] ss:$16 sps:$4 sm:$0xff]  }
 0x105   :  { %1340 = vmatpush2.bf16.msra.mxu1 %v3905_v3  ;;  %1386 = vmatprep.subr.bf16.mxu0 %v3910_v4  ;;  %v3970_v3 = vld [vmem:[%s5468_s2 + $0x34c] ss:$16 sps:$4 sm:$0xff]  }
 0x106   :  { %1341 = vmatprep.subr.bf16.mxu1 %v3913_v5  ;;  %v4007_v4 = vld [vmem:[%s5469_s3 + $0x208] ss:$20 sps:$4 sm:$0xff]   ;;  %v4012_v5 = vld [vmem:[%s5469_s3 + $0x1e4] ss:$20 sps:$4 sm:$0xff]  }
 0x108   :  { %1387 = vmatpush2.bf16.msra.mxu0 %v3908_v6  ;;  %v3968_v6 = vld [vmem:[%s5468_s2 + $0x348] ss:$16 sps:$4 sm:$0xff]  }
 0x109   :  { %1342 = vmatpush2.bf16.msra.mxu1 %v3911_v7  ;;  %1388 = vmatprep.subr.bf16.mxu0 %v3916_v10  ;;  %v3973_v7 = vld [vmem:[%s5468_s2 + $0x32c] ss:$16 sps:$4 sm:$0xff]   ;;  %v4010_v10 = vld [vmem:[%s5469_s3 + $0x1e0] ss:$20 sps:$4 sm:$0xff]  }
 0x10a   :  { %1343 = vmatprep.subr.bf16.mxu1 %v3919_v11  ;;  %v3971_v11 = vld [vmem:[%s5468_s2 + $0x328] ss:$16 sps:$4 sm:$0xff]  }
 0x10c   :  { %1389 = vmatpush2.bf16.msra.mxu0 %v3914_v13  ;;  %v3976_v13 = vld [vmem:[%s5468_s2 + $0x30c] ss:$16 sps:$4 sm:$0xff]  }
 0x10d   :  { %1344 = vmatpush2.bf16.msra.mxu1 %v3917_v14  ;;  %1390 = vmatprep.subr.bf16.mxu0 %v3922_v15  ;;  %v3974_v14 = vld [vmem:[%s5468_s2 + $0x308] ss:$16 sps:$4 sm:$0xff]   ;;  %v4015_v15 = vld [vmem:[%s5469_s3 + $0x1bc] ss:$20 sps:$4 sm:$0xff]  }
 0x10e   :  { %1345 = vmatprep.subr.bf16.mxu1 %v3925_v16  ;;  %v4013_v16 = vld [vmem:[%s5469_s3 + $0x1b8] ss:$20 sps:$4 sm:$0xff]  }
 0x110   :  { %1391 = vmatpush2.bf16.msra.mxu0 %v3920_v17  ;;  %v4018_v17 = vld [vmem:[%s5469_s3 + $0x194] ss:$20 sps:$4 sm:$0xff]  }
 0x111   :  { %1346 = vmatpush2.bf16.msra.mxu1 %v3923_v18  ;;  %2306 = vmatprep.subr.bf16.mxu0 %v3979_v28  ;;  %v4016_v18 = vld [vmem:[%s5469_s3 + $0x190] ss:$20 sps:$4 sm:$0xff]   ;;  %v4043_v28 = vld [vmem:[%s5469_s3 + $0x320] ss:$20 sps:$4 sm:$0xff]  }
 0x112   :  { %1347 = vmatprep.subr.bf16.mxu1 %v3928_v19  ;;  %v4021_v19 = vld [vmem:[%s5469_s3 + $0x16c] ss:$20 sps:$4 sm:$0xff]  }
 0x113   :  { %1393 = vmatmul.mubr.bf16.vlgmr.msra.gmra.mxu0 %v4421_v9  ;;  %v3937_v9 = vld [vmem:[%s5468_s2 + $0x2ac] ss:$16 sps:$4 sm:$0xff]  }
 0x115   :  { %1348 = vmatpush2.bf16.msra.mxu1 %v3926_v20  ;;  %v4019_v20 = vld [vmem:[%s5469_s3 + $0x168] ss:$20 sps:$4 sm:$0xff]  }
 0x116   :  { %1403 = vmatprep.subr.bf16.mxu1 %v3931_v21  ;;  %v4022_v21 = vld [vmem:[%s5469_s3 + $0x140] ss:$20 sps:$4 sm:$0xff]  }
 0x118   :  { %1350 = vmatmul.mubr.bf16.vlgmr.msra.gmra.mxu1 %v4426_v12 }
 0x119   :  { %1404 = vmatpush1.bf16.msra.mxu1 %v3929_v22  ;;  %1435 = vmatprep.mubr.bf16.mxu1 %v4442_v25  ;;  %v3977_v25 = vld [vmem:[%s5469_s3 + $0x118] ss:$20 sps:$4 sm:$0xff]   ;;  %v4027_v22 = vld [vmem:[%s5469_s3 + $0x39c] ss:$20 sps:$4 sm:$0xff]  }
 0x11a   :  { %1405 = vmatprep.subr.bf16.mxu1 %v3934_v23  ;;  %2307 = vmatpush1.bf16.msra.mxu0 %v3977_v25  ;;  %v4030_v23 = vld [vmem:[%s5469_s3 + $0x124] ss:$20 sps:$4 sm:$0xff]   ;;  %v4039_v25 = vld [vmem:[%s5469_s3 + $0x34c] ss:$20 sps:$4 sm:$0xff]  }
 0x11b   :  { %2308 = vmatprep.subr.bf16.mxu0 %v3982_v30  ;;  %v4049_v30 = vld [vmem:[%s5469_s3 + $0x2f8] ss:$20 sps:$4 sm:$0xff]  }
 0x11d   :  { %1406 = vmatpush1.bf16.msra.mxu1 %v3932_v24  ;;  %v4025_v24 = vld [vmem:[%s5469_s3 + $0x398] ss:$20 sps:$4 sm:$0xff]  }
 0x11e   :  { %1407 = vmatprep.subr.bf16.mxu1 %v3937_v9  ;;  %2309 = vmatpush1.bf16.msra.mxu0 %v3980_v32  ;;  %v4031_v9 = vld [vmem:[%s5469_s3 + $0x370] ss:$20 sps:$4 sm:$0xff]  }
 0x11f   :  { %2310 = vmatprep.subr.bf16.mxu0 %v3985_v33  ;;  %v4055_v32 = vld [vmem:[%s5469_s3 + $0x2d0] ss:$20 sps:$4 sm:$0xff]   ;;  %v4057_v33 = vld [vmem:[%s5469_s3 + $0x2d4] ss:$20 sps:$4 sm:$0xff]  }
 0x121   :  { %1408 = vmatpush1.bf16.msra.mxu1 %v3935_v26  ;;  %v4033_v26 = vld [vmem:[%s5469_s3 + $0x374] ss:$20 sps:$4 sm:$0xff]  }
 0x122   :  { %1409 = vmatprep.subr.bf16.mxu1 %v3940_v27  ;;  %2311 = vmatpush1.bf16.msra.mxu0 %v3983_v36  ;;  %v4037_v27 = vld [vmem:[%s5469_s3 + $0x348] ss:$20 sps:$4 sm:$0xff]   ;;  %v4067_v36 = vld [vmem:[%s5469_s3 + $0x280] ss:$20 sps:$4 sm:$0xff]  }
 0x123   :  { %2312 = vmatprep.subr.bf16.mxu0 %v3988_v37  ;;  %v4069_v37 = vld [vmem:[%s5469_s3 + $0x284] ss:$20 sps:$4 sm:$0xff]  }
 0x125   :  { %1410 = vmatpush1.bf16.msra.mxu1 %v3938_v29  ;;  %v4045_v29 = vld [vmem:[%s5469_s3 + $0x324] ss:$20 sps:$4 sm:$0xff]  }
 0x126   :  { %1411 = vmatprep.subr.bf16.mxu1 %v3943_v31  ;;  %2313 = vmatpush1.bf16.msra.mxu0 %v3986_v40  ;;  %v4051_v31 = vld [vmem:[%s5469_s3 + $0x2fc] ss:$20 sps:$4 sm:$0xff]  }
 0x127   :  { %2314 = vmatprep.subr.bf16.mxu0 %v3991_v41  ;;  %v4079_v40 = vld [vmem:[%s5469_s3 + $0x4b0] ss:$20 sps:$4 sm:$0xff]   ;;  %v4081_v41 = vld [vmem:[%s5469_s3 + $0x4b4] ss:$20 sps:$4 sm:$0xff]  }
 0x129   :  { %1412 = vmatpush1.bf16.msra.mxu1 %v3941_v34  ;;  %v4061_v34 = vld [vmem:[%s5469_s3 + $0x2a8] ss:$20 sps:$4 sm:$0xff]  }
 0x12a   :  { %1413 = vmatprep.subr.bf16.mxu1 %v3946_v35  ;;  %2315 = vmatpush1.bf16.msra.mxu0 %v3989_v44  ;;  %v4063_v35 = vld [vmem:[%s5469_s3 + $0x2ac] ss:$20 sps:$4 sm:$0xff]  }
 0x12b   :  { %2316 = vmatprep.subr.bf16.mxu0 %v3994_v45  ;;  %v4091_v44 = vld [vmem:[%s5469_s3 + $0x460] ss:$20 sps:$4 sm:$0xff]   ;;  %v4093_v45 = vld [vmem:[%s5469_s3 + $0x464] ss:$20 sps:$4 sm:$0xff]  }
 0x12d   :  { %1414 = vmatpush1.bf16.msra.mxu1 %v3944_v38  ;;  %v4073_v38 = vld [vmem:[%s5469_s3 + $0x4d8] ss:$20 sps:$4 sm:$0xff]  }
 0x12e   :  { %1415 = vmatprep.subr.bf16.mxu1 %v3949_v39  ;;  %2317 = vmatpush1.bf16.msra.mxu0 %v3992_v48  ;;  %v4075_v39 = vld [vmem:[%s5469_s3 + $0x4dc] ss:$20 sps:$4 sm:$0xff]  }
 0x12f   :  { %2318 = vmatprep.subr.bf16.mxu0 %v3997_v49  ;;  %v4105_v49 = vld [vmem:[%s5469_s3 + $0x414] ss:$20 sps:$4 sm:$0xff]  }
 0x131   :  { %1416 = vmatpush1.bf16.msra.mxu1 %v3947_v42  ;;  %v4085_v42 = vld [vmem:[%s5469_s3 + $0x488] ss:$20 sps:$4 sm:$0xff]  }
 0x132   :  { %1417 = vmatprep.subr.bf16.mxu1 %v3952_v43  ;;  %2319 = vmatpush1.bf16.msra.mxu0 %v3995_v52  ;;  %v4087_v43 = vld [vmem:[%s5469_s3 + $0x48c] ss:$20 sps:$4 sm:$0xff]  }
 0x133   :  { %2320 = vmatprep.subr.bf16.mxu0 %v4000_v53 }
 0x135   :  { %1418 = vmatpush1.bf16.msra.mxu1 %v3950_v46  ;;  %v4097_v46 = vld [vmem:[%s5469_s3 + $0x438] ss:$20 sps:$4 sm:$0xff]  }
 0x136   :  { %1419 = vmatprep.subr.bf16.mxu1 %v3955_v47  ;;  %2321 = vmatpush1.bf16.msra.mxu0 %v3998_v56  ;;  %v4099_v47 = vld [vmem:[%s5469_s3 + $0x43c] ss:$20 sps:$4 sm:$0xff]  }
 0x137   :  { %2322 = vmatprep.subr.bf16.mxu0 %v4003_v57  ;;  %v4109_v57 = vld [vmem:[%s5469_s3 + $0x3e8] ss:$20 sps:$4 sm:$0xff]  }
 0x139   :  { %1420 = vmatpush2.bf16.msra.mxu1 %v3953_v50 }
 0x13a   :  { %1421 = vmatprep.subr.bf16.mxu1 %v3958_v51  ;;  %2323 = vmatpush2.bf16.msra.mxu0 %v4001_v60  ;;  %v4103_v51 = vld [vmem:[%s5469_s3 + $0x410] ss:$20 sps:$4 sm:$0xff]  }
 0x13b   :  { %2324 = vmatprep.subr.bf16.mxu0 %v4006_v61  ;;  %v4117_v61 = vld [vmem:[%s5469_s3 + $0x3c4] ss:$20 sps:$4 sm:$0xff]  }
 0x13d   :  { %1422 = vmatpush2.bf16.msra.mxu1 %v3956_v54 }
 0x13e   :  { %1423 = vmatprep.subr.bf16.mxu1 %v3961_v55  ;;  %2325 = vmatpush2.bf16.msra.mxu0 %v4004_v0  ;;  %v4111_v55 = vld [vmem:[%s5469_s3 + $0x3ec] ss:$20 sps:$4 sm:$0xff]  }
 0x13f   :  { %2326 = vmatprep.subr.bf16.mxu0 %v4009_v1 }
 0x141   :  { %1424 = vmatpush2.bf16.msra.mxu1 %v3959_v58 }
 0x142   :  { %1425 = vmatprep.subr.bf16.mxu1 %v3964_v59  ;;  %2327 = vmatpush2.bf16.msra.mxu0 %v4007_v4 }
 0x143   :  { %2328 = vmatprep.subr.bf16.mxu0 %v4012_v5 }
 0x145   :  { %1426 = vmatpush2.bf16.msra.mxu1 %v3962_v62  ;;  %v4115_v62 = vld [vmem:[%s5469_s3 + $0x3c0] ss:$20 sps:$4 sm:$0xff]  }
 0x146   :  { %1427 = vmatprep.subr.bf16.mxu1 %v3967_v63  ;;  %2329 = vmatpush2.bf16.msra.mxu0 %v4010_v10  ;;  %v4123_v63 = vld [vmem:[%s5469_s3 + $0x3a4] ss:$20 sps:$4 sm:$0xff]  }
 0x147   :  { %2330 = vmatprep.subr.bf16.mxu0 %v4015_v15 }
 0x149   :  { %1428 = vmatpush2.bf16.msra.mxu1 %v3965_v2 }
 0x14a   :  { %1429 = vmatprep.subr.bf16.mxu1 %v3970_v3  ;;  %2331 = vmatpush2.bf16.msra.mxu0 %v4013_v16 }
 0x14b   :  { %2332 = vmatprep.subr.bf16.mxu0 %v4018_v17 }
 0x14d   :  { %1430 = vmatpush2.bf16.msra.mxu1 %v3968_v6 }
 0x14e   :  { %1431 = vmatprep.subr.bf16.mxu1 %v3973_v7  ;;  %2333 = vmatpush2.bf16.msra.mxu0 %v4016_v18 }
 0x14f   :  { %2334 = vmatprep.subr.bf16.mxu0 %v4021_v19 }
 0x151   :  { %1432 = vmatpush2.bf16.msra.mxu1 %v3971_v11 }
 0x152   :  { %1433 = vmatprep.subr.bf16.mxu1 %v3976_v13  ;;  %2335 = vmatpush2.bf16.msra.mxu0 %v4019_v20 }
 0x155   :  { %1434 = vmatpush2.bf16.msra.mxu1 %v3974_v14 }
 0x156   :  { %2349 = vmatprep.subr.bf16.mxu1 %v4027_v22 }
 0x158   :  { %1436 = vmatmul.mubr.bf16.vlgmr.msra.gmra.mxu1 %v4426_v12  ;;  %v4024_v12 = vld [vmem:[%s5469_s3 + $0x144] ss:$20 sps:$4 sm:$0xff]  }
 0x159   :  { %2336 = vmatprep.subr.bf16.mxu0 %v4024_v12  ;;  %2350 = vmatpush1.bf16.msra.mxu1 %v4025_v24 }
 0x15a   :  { %2337 = vmatpush2.bf16.msra.mxu0 %v4022_v21  ;;  %2351 = vmatprep.subr.bf16.mxu1 %v4033_v26  ;;  %v4034_v26 = vld [vmem:[%s5469_s3 + $0xf8] ss:$20 sps:$4 sm:$0xff]  }
 0x15b   :  { %2392 = vmatprep.subr.bf16.mxu0 %v4030_v23  ;;  %v4028_v23 = vld [vmem:[%s5469_s3 + $0x120] ss:$20 sps:$4 sm:$0xff]  }
 0x15d   :  { %2352 = vmatpush1.bf16.msra.mxu1 %v4031_v9  ;;  %v4036_v9 = vld [vmem:[%s5469_s3 + $0xfc] ss:$20 sps:$4 sm:$0xff]  }
 0x15e   :  { %2353 = vmatprep.subr.bf16.mxu1 %v4039_v25  ;;  %v4040_v25 = vld [vmem:[%s5469_s3 + $0xd0] ss:$20 sps:$4 sm:$0xff]  }
 0x161   :  { %2354 = vmatpush1.bf16.msra.mxu1 %v4037_v27  ;;  %v4042_v27 = vld [vmem:[%s5469_s3 + $0xd4] ss:$20 sps:$4 sm:$0xff]  }
 0x162   :  { %2355 = vmatprep.subr.bf16.mxu1 %v4045_v29  ;;  %v4046_v29 = vld [vmem:[%s5469_s3 + $0xa8] ss:$20 sps:$4 sm:$0xff]  }
 0x165   :  { %2356 = vmatpush1.bf16.msra.mxu1 %v4043_v28  ;;  %v4048_v28 = vld [vmem:[%s5469_s3 + $0xac] ss:$20 sps:$4 sm:$0xff]  }
 0x166   :  { %2357 = vmatprep.subr.bf16.mxu1 %v4051_v31  ;;  %v4052_v31 = vld [vmem:[%s5469_s3 + $0x80] ss:$20 sps:$4 sm:$0xff]  }
 0x169   :  { %2358 = vmatpush1.bf16.msra.mxu1 %v4049_v30  ;;  %v4054_v30 = vld [vmem:[%s5469_s3 + $0x84] ss:$20 sps:$4 sm:$0xff]  }
 0x16a   :  { %2359 = vmatprep.subr.bf16.mxu1 %v4057_v33  ;;  %v4058_v33 = vld [vmem:[%s5469_s3 + $0x58] ss:$20 sps:$4 sm:$0xff]  }
 0x16d   :  { %2360 = vmatpush1.bf16.msra.mxu1 %v4055_v32  ;;  %v4060_v32 = vld [vmem:[%s5469_s3 + $0x5c] ss:$20 sps:$4 sm:$0xff]  }
 0x16e   :  { %2361 = vmatprep.subr.bf16.mxu1 %v4063_v35  ;;  %v4064_v35 = vld [vmem:[%s5469_s3 + $0x30] ss:$20 sps:$4 sm:$0xff]  }
 0x171   :  { %2362 = vmatpush1.bf16.msra.mxu1 %v4061_v34  ;;  %v4066_v34 = vld [vmem:[%s5469_s3 + $0x34] ss:$20 sps:$4 sm:$0xff]  }
 0x172   :  { %2363 = vmatprep.subr.bf16.mxu1 %v4069_v37  ;;  %v4070_v37 = vld [vmem:[%s5469_s3 + $0x8] ss:$20 sps:$4 sm:$0xff]  }
 0x175   :  { %2364 = vmatpush1.bf16.msra.mxu1 %v4067_v36  ;;  %v4072_v36 = vld [vmem:[%s5469_s3 + $0xc] ss:$20 sps:$4 sm:$0xff]  }
 0x176   :  { %2365 = vmatprep.subr.bf16.mxu1 %v4075_v39  ;;  %v4076_v39 = vld [vmem:[%s5469_s3 + $0x260] ss:$20 sps:$4 sm:$0xff]  }
 0x179   :  { %2366 = vmatpush2.bf16.msra.mxu1 %v4073_v38  ;;  %v4078_v38 = vld [vmem:[%s5469_s3 + $0x264] ss:$20 sps:$4 sm:$0xff]  }
 0x17a   :  { %2367 = vmatprep.subr.bf16.mxu1 %v4081_v41  ;;  %v4082_v41 = vld [vmem:[%s5469_s3 + $0x238] ss:$20 sps:$4 sm:$0xff]  }
 0x17d   :  { %2368 = vmatpush2.bf16.msra.mxu1 %v4079_v40  ;;  %v4084_v40 = vld [vmem:[%s5469_s3 + $0x23c] ss:$20 sps:$4 sm:$0xff]  }
 0x17e   :  { %2369 = vmatprep.subr.bf16.mxu1 %v4087_v43  ;;  %v4088_v43 = vld [vmem:[%s5469_s3 + $0x210] ss:$20 sps:$4 sm:$0xff]  }
 0x181   :  { %2370 = vmatpush2.bf16.msra.mxu1 %v4085_v42  ;;  %v4090_v42 = vld [vmem:[%s5469_s3 + $0x214] ss:$20 sps:$4 sm:$0xff]  }
 0x182   :  { %2371 = vmatprep.subr.bf16.mxu1 %v4093_v45  ;;  %v4094_v45 = vld [vmem:[%s5469_s3 + $0x1e8] ss:$20 sps:$4 sm:$0xff]  }
 0x185   :  { %2372 = vmatpush2.bf16.msra.mxu1 %v4091_v44  ;;  %v4096_v44 = vld [vmem:[%s5469_s3 + $0x1ec] ss:$20 sps:$4 sm:$0xff]  }
 0x186   :  { %2373 = vmatprep.subr.bf16.mxu1 %v4099_v47 }
 0x189   :  { %2374 = vmatpush2.bf16.msra.mxu1 %v4097_v46  ;;  %v4102_v46 = vld [vmem:[%s5469_s3 + $0x1c4] ss:$20 sps:$4 sm:$0xff]  }
 0x18a   :  { %2375 = vmatprep.subr.bf16.mxu1 %v4105_v49  ;;  %v4108_v49 = vld [vmem:[%s5469_s3 + $0x19c] ss:$20 sps:$4 sm:$0xff]  }
 0x18d   :  { %2376 = vmatpush2.bf16.msra.mxu1 %v4103_v51 }
 0x18e   :  { %2377 = vmatprep.subr.bf16.mxu1 %v4111_v55 }
 0x191   :  { %2378 = vmatpush2.bf16.msra.mxu1 %v4109_v57 }
 0x192   :  { %2379 = vmatprep.subr.bf16.mxu1 %v4117_v61 }
 0x193   :  { %v1308_v0 = vpop.f32.mrf.mxu0 }
 0x195   :  { %2380 = vmatpush2.bf16.msra.mxu1 %v4115_v62  ;;  %v1310_v1 = vpop.f32.mrf.mxu0  ;;  %v4112_v62 = vld [vmem:[%s5469_s3 + $0x170] ss:$20 sps:$4 sm:$0xff]  }
 0x196   :  { %2435 = vmatprep.subr.bf16.mxu1 %v4123_v63 }
 0x197   :  { %v1312_v3 = vpop.f32.mrf.mxu0 }
 0x198   :  { %v617_v48 = vpop.f32.mrf.mxu1 }
 0x199   :  { %v626_v52 = vmul.f32 0.01, %v617_v48  ;;  %vm624_vm13 = vcmp.gt.f32.partialorder %v617_v48, 0.0  ;;  %v1314_v11 = vpop.f32.mrf.mxu0 }
 0x19a   :  { %v3696_v50 = vpop.f32.mrf.mxu1 }
 0x19b   :  { %v4903_v58 = vsel %vm624_vm13, %v617_v48, %v626_v52  ;;  %v4100_v48 = vld [vmem:[%s5469_s3 + $0x1c0] ss:$20 sps:$4 sm:$0xff]   ;;  %v4106_v52 = vld [vmem:[%s5469_s3 + $0x198] ss:$20 sps:$4 sm:$0xff]  }
 0x19c   :  { %v620_v53 = vpop.f32.mrf.mxu1 }
 0x19d   :  { %vm625_vm14 = vcmp.gt.f32.partialorder %v620_v53, 0.0  ;;  %v627_v54 = vmul.f32 0.01, %v620_v53 }
 0x19e   :  { %v3697_v56 = vpop.f32.mrf.mxu1 }
 0x19f   :  { %v4905_v59 = vsel %vm625_vm14, %v620_v53, %v627_v54  ;;  %v4114_v53 = vld [vmem:[%s5469_s3 + $0x174] ss:$20 sps:$4 sm:$0xff]  }
 0x1a0   :  { %v2590_v60 = vpack.c.bf16 %v4905_v59, %v4903_v58  ;;  %v4203_v58 = vld [vmem:[%s5470_s4 + $0x28] sm:$0xff]   ;;  %v4204_v59 = vld [vmem:[%s5470_s4 + $0x20] sm:$0xff]  }
 0x1d3   :  { %v1394_v47 = vpop.f32.mrf.mxu0 }
 0x1d5   :  { %v1396_v50 = vpop.f32.mrf.mxu0 }
 0x1d7   :  { %v1398_v54 = vpop.f32.mrf.mxu0 }
 0x1d8   :  { %v1351_v2 = vpop.f32.mrf.mxu1 }
 0x1d9   :  { %v1352_v6 = vadd.f32 %v1351_v2, %v1308_v0  ;;  %v4120_v0 = vld [vmem:[%s5469_s3 + $0x14c] ss:$20 sps:$4 sm:$0xff]  }
 0x1da   :  { %v1353_v4 = vpop.f32.mrf.mxu1 }
 0x1db   :  { %v1354_v5 = vadd.f32 %v1353_v4, %v1310_v1  ;;  %v1454_v17 = vmul.f32 0.01, %v1352_v6  ;;  %vm1446_vm2 = vcmp.gt.f32.partialorder %v1352_v6, 0.0  ;;  %v1400_v1 = vpop.f32.mrf.mxu0 }
 0x1dc   :  { %v1355_v7 = vpop.f32.mrf.mxu1 }
 0x1dd   :  { %v1356_v10 = vadd.f32 %v1355_v7, %v1312_v3  ;;  %v1455_v14 = vmul.f32 0.01, %v1354_v5  ;;  %vm1447_vm0 = vcmp.gt.f32.partialorder %v1354_v5, 0.0  ;;  %v1462_v21 = vsel %vm1446_vm2, %v1352_v6, %v1454_v17  ;;  %v4118_v7 = vld [vmem:[%s5469_s3 + $0x148] ss:$20 sps:$4 sm:$0xff]  }
 0x1de   :  { %v1357_v13 = vpop.f32.mrf.mxu1 }
 0x1df   :  { %vm1450_vm15 = vcmp.gt.f32.partialorder %v1356_v10, 0.0  ;;  %v1458_v15 = vmul.f32 0.01, %v1356_v10  ;;  %v1358_v16 = vadd.f32 %v1357_v13, %v1314_v11  ;;  %v1463_v20 = vsel %vm1447_vm0, %v1354_v5, %v1455_v14  ;;  %v5021_v11 = vld [vmem:[%s5469_s3 + $0x268] ss:$20 sps:$4 sm:$0xff]  }
 0x1e1   :  { %vm1451_vm3 = vcmp.gt.f32.partialorder %v1358_v16, 0.0  ;;  %v1459_v18 = vmul.f32 0.01, %v1358_v16  ;;  %v1466_v19 = vsel %vm1450_vm15, %v1356_v10, %v1458_v15 }
 0x1e2   :  { %v4923_v24 = vpack.c.bf16 %v1466_v19, %v1462_v21  ;;  %v5031_v19 = vld [vmem:[%s5469_s3 + $0x128] ss:$20 sps:$4 sm:$0xff]   ;;  %v5043_v21 = vld [vmem:[%s5469_s3 + $0x240] ss:$20 sps:$4 sm:$0xff]  }
 0x1e3   :  { %v1467_v12 = vsel %vm1451_vm3, %v1358_v16, %v1459_v18  ;;  %v4121_v18 = vld [vmem:[%s5469_s3 + $0x3a0] ss:$20 sps:$4 sm:$0xff]  }
 0x1e4   :  { %v4918_v22 = vpack.c.bf16 %v1467_v12, %v1463_v20  ;;  %v4128_v12 = vld [vmem:[%s5469_s3 + $0x37c] ss:$20 sps:$4 sm:$0xff]  }
 0x1e6   :  { %2338 = vmatprep.mubr.bf16.mxu0 %v4918_v22 }
 0x1e7   :  { %2339 = vmatmul.mubr.bf16.vlgmr.msra.gmra.mxu0 %v4923_v24 }
 0x1e8   :  { %2393 = vmatpush1.bf16.msra.mxu0 %v4028_v23  ;;  %2424 = vmatprep.mubr.bf16.mxu0 %v4918_v22  ;;  %v4126_v23 = vld [vmem:[%s5469_s3 + $0x378] ss:$20 sps:$4 sm:$0xff]  }
 0x1e9   :  { %2394 = vmatprep.subr.bf16.mxu0 %v4036_v9  ;;  %v5054_v9 = vld [vmem:[%s5469_s3 + $0x100] ss:$20 sps:$4 sm:$0xff]  }
 0x1ec   :  { %2395 = vmatpush1.bf16.msra.mxu0 %v4034_v26  ;;  %v4133_v26 = vld [vmem:[%s5469_s3 + $0x354] ss:$20 sps:$4 sm:$0xff]  }
 0x1ed   :  { %2396 = vmatprep.subr.bf16.mxu0 %v4042_v27  ;;  %v5064_v27 = vld [vmem:[%s5469_s3 + $0x218] ss:$20 sps:$4 sm:$0xff]  }
 0x1f0   :  { %2397 = vmatpush1.bf16.msra.mxu0 %v4040_v25  ;;  %v5074_v25 = vld [vmem:[%s5469_s3 + $0xd8] ss:$20 sps:$4 sm:$0xff]  }
 0x1f1   :  { %2398 = vmatprep.subr.bf16.mxu0 %v4048_v28  ;;  %v4138_v28 = vld [vmem:[%s5469_s3 + $0x32c] ss:$20 sps:$4 sm:$0xff]  }
 0x1f4   :  { %2399 = vmatpush1.bf16.msra.mxu0 %v4046_v29  ;;  %v5083_v29 = vld [vmem:[%s5469_s3 + $0x1f0] ss:$20 sps:$4 sm:$0xff]  }
 0x1f5   :  { %2400 = vmatprep.subr.bf16.mxu0 %v4054_v30  ;;  %v4136_v30 = vld [vmem:[%s5469_s3 + $0x328] ss:$20 sps:$4 sm:$0xff]  }
 0x1f8   :  { %2401 = vmatpush1.bf16.msra.mxu0 %v4052_v31  ;;  %v5092_v31 = vld [vmem:[%s5469_s3 + $0xb0] ss:$20 sps:$4 sm:$0xff]  }
 0x1f9   :  { %2402 = vmatprep.subr.bf16.mxu0 %v4060_v32  ;;  %v4143_v32 = vld [vmem:[%s5469_s3 + $0x304] ss:$20 sps:$4 sm:$0xff]  }
 0x1fc   :  { %2403 = vmatpush1.bf16.msra.mxu0 %v4058_v33  ;;  %v5101_v33 = vld [vmem:[%s5469_s3 + $0x1c8] ss:$20 sps:$4 sm:$0xff]  }
 0x1fd   :  { %2404 = vmatprep.subr.bf16.mxu0 %v4066_v34  ;;  %v4141_v34 = vld [vmem:[%s5469_s3 + $0x300] ss:$20 sps:$4 sm:$0xff]  }
 0x200   :  { %2405 = vmatpush1.bf16.msra.mxu0 %v4064_v35  ;;  %v5110_v35 = vld [vmem:[%s5469_s3 + $0x88] ss:$20 sps:$4 sm:$0xff]  }
 0x201   :  { %2406 = vmatprep.subr.bf16.mxu0 %v4072_v36  ;;  %v4148_v36 = vld [vmem:[%s5469_s3 + $0x2dc] ss:$20 sps:$4 sm:$0xff]  }
 0x204   :  { %2407 = vmatpush1.bf16.msra.mxu0 %v4070_v37  ;;  %v5119_v37 = vld [vmem:[%s5469_s3 + $0x1a0] ss:$20 sps:$4 sm:$0xff]  }
 0x205   :  { %2408 = vmatprep.subr.bf16.mxu0 %v4078_v38  ;;  %v4146_v38 = vld [vmem:[%s5469_s3 + $0x2d8] ss:$20 sps:$4 sm:$0xff]  }
 0x208   :  { %2409 = vmatpush2.bf16.msra.mxu0 %v4076_v39  ;;  %v5128_v39 = vld [vmem:[%s5469_s3 + $0x60] ss:$20 sps:$4 sm:$0xff]  }
 0x209   :  { %2410 = vmatprep.subr.bf16.mxu0 %v4084_v40  ;;  %v4153_v40 = vld [vmem:[%s5469_s3 + $0x2b4] ss:$20 sps:$4 sm:$0xff]  }
 0x20c   :  { %2411 = vmatpush2.bf16.msra.mxu0 %v4082_v41  ;;  %v5137_v41 = vld [vmem:[%s5469_s3 + $0x178] ss:$20 sps:$4 sm:$0xff]  }
 0x20d   :  { %2412 = vmatprep.subr.bf16.mxu0 %v4090_v42  ;;  %v4151_v42 = vld [vmem:[%s5469_s3 + $0x2b0] ss:$20 sps:$4 sm:$0xff]  }
 0x210   :  { %2413 = vmatpush2.bf16.msra.mxu0 %v4088_v43  ;;  %v5146_v43 = vld [vmem:[%s5469_s3 + $0x38] ss:$20 sps:$4 sm:$0xff]  }
 0x211   :  { %2414 = vmatprep.subr.bf16.mxu0 %v4096_v44  ;;  %v4158_v44 = vld [vmem:[%s5469_s3 + $0x28c] ss:$20 sps:$4 sm:$0xff]  }
 0x214   :  { %2415 = vmatpush2.bf16.msra.mxu0 %v4094_v45  ;;  %v5155_v45 = vld [vmem:[%s5469_s3 + $0x150] ss:$20 sps:$4 sm:$0xff]  }
 0x215   :  { %2416 = vmatprep.subr.bf16.mxu0 %v4102_v46  ;;  %v4156_v46 = vld [vmem:[%s5469_s3 + $0x288] ss:$20 sps:$4 sm:$0xff]  }
 0x218   :  { %2417 = vmatpush2.bf16.msra.mxu0 %v4100_v48  ;;  %v1437_v51 = vpop.f32.mrf.mxu1  ;;  %v4163_v48 = vld [vmem:[%s5469_s3 + $0x4e4] ss:$20 sps:$4 sm:$0xff]  }
 0x219   :  { %2418 = vmatprep.subr.bf16.mxu0 %v4108_v49  ;;  %v1438_v57 = vadd.f32 %v1437_v51, %v1394_v47  ;;  %v5164_v47 = vld [vmem:[%s5469_s3 + $0x10] ss:$20 sps:$4 sm:$0xff]   ;;  %v4161_v49 = vld [vmem:[%s5469_s3 + $0x4e0] ss:$20 sps:$4 sm:$0xff]   ;;  %v4164_v51 = vld [vmem:[%s5469_s3 + $0x4b8] ss:$20 sps:$4 sm:$0xff]  }
 0x21a   :  { %v1439_v55 = vpop.f32.mrf.mxu1 }
 0x21b   :  { %v1440_v56 = vadd.f32 %v1439_v55, %v1396_v50  ;;  %v1456_v6 = vmul.f32 0.01, %v1438_v57  ;;  %vm1448_vm6 = vcmp.gt.f32.partialorder %v1438_v57, 0.0  ;;  %v4166_v50 = vld [vmem:[%s5469_s3 + $0x4bc] ss:$20 sps:$4 sm:$0xff]  }
 0x21c   :  { %2419 = vmatpush2.bf16.msra.mxu0 %v4106_v52  ;;  %v1441_v61 = vpop.f32.mrf.mxu1  ;;  %v4169_v52 = vld [vmem:[%s5469_s3 + $0x494] ss:$20 sps:$4 sm:$0xff]   ;;  %v4175_v55 = vld [vmem:[%s5469_s3 + $0x444] ss:$20 sps:$4 sm:$0xff]  }
 0x21d   :  { %v1442_v63 = vadd.f32 %v1441_v61, %v1398_v54  ;;  %2420 = vmatprep.subr.bf16.mxu0 %v4114_v53  ;;  %v1457_v3 = vmul.f32 0.01, %v1440_v56  ;;  %vm1449_vm5 = vcmp.gt.f32.partialorder %v1440_v56, 0.0  ;;  %v1464_v16 = vsel %vm1448_vm6, %v1438_v57, %v1456_v6  ;;  %v4167_v53 = vld [vmem:[%s5469_s3 + $0x490] ss:$20 sps:$4 sm:$0xff]  }
 0x21e   :  { %v1443_v2 = vpop.f32.mrf.mxu1  ;;  %v4170_v54 = vld [vmem:[%s5469_s3 + $0x468] ss:$20 sps:$4 sm:$0xff]   ;;  %v4176_v61 = vld [vmem:[%s5469_s3 + $0x418] ss:$20 sps:$4 sm:$0xff]  }
 0x21f   :  { %vm1452_vm4 = vcmp.gt.f32.partialorder %v1442_v63, 0.0  ;;  %v1460_v4 = vmul.f32 0.01, %v1442_v63  ;;  %v1444_v5 = vadd.f32 %v1443_v2, %v1400_v1  ;;  %v1465_v14 = vsel %vm1449_vm5, %v1440_v56, %v1457_v3  ;;  %v4173_v56 = vld [vmem:[%s5469_s3 + $0x440] ss:$20 sps:$4 sm:$0xff]  }
 0x220   :  { %2421 = vmatpush2.bf16.msra.mxu0 %v4112_v62  ;;  %v4178_v57 = vld [vmem:[%s5469_s3 + $0x41c] ss:$20 sps:$4 sm:$0xff]   ;;  %v4181_v62 = vld [vmem:[%s5469_s3 + $0x3f4] ss:$20 sps:$4 sm:$0xff]   ;;  %v5248_v6 = vld [vmem:[%s5469_s3 + $0x498] ss:$20 sps:$4 sm:$0xff]  }
 0x221   :  { %vm1453_vm7 = vcmp.gt.f32.partialorder %v1444_v5, 0.0  ;;  %v1461_v10 = vmul.f32 0.01, %v1444_v5  ;;  %2422 = vmatprep.subr.bf16.mxu0 %v4120_v0  ;;  %v1468_v13 = vsel %vm1452_vm4, %v1442_v63, %v1460_v4  ;;  %v4179_v63 = vld [vmem:[%s5469_s3 + $0x3f0] ss:$20 sps:$4 sm:$0xff]  }
 0x222   :  { %v5033_v20 = vpack.c.bf16 %v1468_v13, %v1464_v16  ;;  %v4184_v0 = vld [vmem:[%s5469_s3 + $0x3cc] ss:$20 sps:$4 sm:$0xff]   ;;  %v4182_v1 = vld [vmem:[%s5469_s3 + $0x3c8] ss:$20 sps:$4 sm:$0xff]   ;;  %v5266_v13 = vld [vmem:[%s5469_s3 + $0x330] ss:$20 sps:$4 sm:$0xff]  }
 0x223   :  { %v1469_v15 = vsel %vm1453_vm7, %v1444_v5, %v1461_v10  ;;  %v5223_v2 = vld [vmem:[%s5469_s3 + $0x4e8] ss:$20 sps:$4 sm:$0xff]   ;;  %v5234_v4 = vld [vmem:[%s5469_s3 + $0x4c0] ss:$20 sps:$4 sm:$0xff]   ;;  %v5260_v10 = vld [vmem:[%s5469_s3 + $0x470] ss:$20 sps:$4 sm:$0xff]  }
 0x224   :  { %2423 = vmatpush2.bf16.msra.mxu0 %v4118_v7  ;;  %v5023_v17 = vpack.c.bf16 %v1469_v15, %v1465_v14  ;;  %v5228_v3 = vld [vmem:[%s5469_s3 + $0x3a8] ss:$20 sps:$4 sm:$0xff]   ;;  %v5242_v5 = vld [vmem:[%s5469_s3 + $0x380] ss:$20 sps:$4 sm:$0xff]   ;;  %v5254_v7 = vld [vmem:[%s5469_s3 + $0x358] ss:$20 sps:$4 sm:$0xff]  }
 0x225   :  { %3569 = vmatprep.subr.bf16.mxu0 %v5021_v11  ;;  %v5272_v14 = vld [vmem:[%s5469_s3 + $0x448] ss:$20 sps:$4 sm:$0xff]   ;;  %v5284_v16 = vld [vmem:[%s5469_s3 + $0x420] ss:$20 sps:$4 sm:$0xff]  }
 0x226   :  { %2381 = vmatprep.mubr.bf16.mxu1 %v5023_v17  ;;  %v5278_v15 = vld [vmem:[%s5469_s3 + $0x308] ss:$20 sps:$4 sm:$0xff]  }
 0x227   :  { %2425 = vmatmul.mubr.bf16.vlgmr.msra.gmra.mxu0 %v4923_v24  ;;  %2382 = vmatmul.mubr.bf16.vlgmr.msra.gmra.mxu1 %v5033_v20 }
 0x228   :  { %2436 = vmatpush1.bf16.msra.mxu1 %v4121_v18  ;;  %3570 = vmatpush3.bf16.msra.mxu0 %v5031_v19  ;;  %v5296_v18 = vld [vmem:[%s5469_s3 + $0x3f8] ss:$20 sps:$4 sm:$0xff]  }
 0x229   :  { %2510 = vmatprep.mubr.bf16.mxu0 %v4918_v22  ;;  %2467 = vmatprep.mubr.bf16.mxu1 %v5023_v17  ;;  %v4131_v22 = vld [vmem:[%s5469_s3 + $0x350] ss:$20 sps:$4 sm:$0xff]  }
 0x22a   :  { %2437 = vmatprep.subr.bf16.mxu1 %v4128_v12  ;;  %3571 = vmatprep.subr.bf16.mxu0 %v5043_v21  ;;  %v5302_v12 = vld [vmem:[%s5469_s3 + $0x2b8] ss:$20 sps:$4 sm:$0xff]  }
 0x22c   :  { %2438 = vmatpush1.bf16.msra.mxu1 %v4126_v23  ;;  %3572 = vmatpush3.bf16.msra.mxu0 %v5054_v9  ;;  %v5308_v23 = vld [vmem:[%s5469_s3 + $0x3d0] ss:$20 sps:$4 sm:$0xff]  }
 0x22d   :  { %2439 = vmatprep.subr.bf16.mxu1 %v4133_v26  ;;  %3573 = vmatprep.subr.bf16.mxu0 %v5064_v27  ;;  %v5314_v26 = vld [vmem:[%s5469_s3 + $0x290] ss:$20 sps:$4 sm:$0xff]  }
 0x230   :  { %2440 = vmatpush1.bf16.msra.mxu1 %v4131_v22  ;;  %3574 = vmatpush3.bf16.msra.mxu0 %v5074_v25  ;;  %v5321_v22 = vld [vmem:[%s5470_s4 + $0x18] sm:$0xff]  }
 0x231   :  { %2441 = vmatprep.subr.bf16.mxu1 %v4138_v28  ;;  %3575 = vmatprep.subr.bf16.mxu0 %v5083_v29  ;;  %v5329_v28 = vld [vmem:[%s5470_s4 + $0x10] sm:$0xff]  }
 0x234   :  { %2442 = vmatpush1.bf16.msra.mxu1 %v4136_v30  ;;  %3576 = vmatpush3.bf16.msra.mxu0 %v5092_v31 }
 0x235   :  { %2443 = vmatprep.subr.bf16.mxu1 %v4143_v32  ;;  %3577 = vmatprep.subr.bf16.mxu0 %v5101_v33 }
 0x238   :  { %2444 = vmatpush1.bf16.msra.mxu1 %v4141_v34  ;;  %3578 = vmatpush3.bf16.msra.mxu0 %v5110_v35 }
 0x239   :  { %2445 = vmatprep.subr.bf16.mxu1 %v4148_v36  ;;  %3579 = vmatprep.subr.bf16.mxu0 %v5119_v37 }
 0x23c   :  { %2446 = vmatpush1.bf16.msra.mxu1 %v4146_v38  ;;  %3580 = vmatpush3.bf16.msra.mxu0 %v5128_v39 }
 0x23d   :  { %2447 = vmatprep.subr.bf16.mxu1 %v4153_v40  ;;  %3581 = vmatprep.subr.bf16.mxu0 %v5137_v41 }
 0x240   :  { %2448 = vmatpush1.bf16.msra.mxu1 %v4151_v42  ;;  %3582 = vmatpush3.bf16.msra.mxu0 %v5146_v43 }
 0x241   :  { %2449 = vmatprep.subr.bf16.mxu1 %v4158_v44  ;;  %3583 = vmatprep.subr.bf16.mxu0 %v5155_v45 }
 0x244   :  { %2450 = vmatpush1.bf16.msra.mxu1 %v4156_v46  ;;  %3584 = vmatpush3.bf16.msra.mxu0 %v5164_v47 }
 0x245   :  { %2451 = vmatprep.subr.bf16.mxu1 %v4163_v48  ;;  %3698 = vmatprep.subr.bf16.mxu0 %v4244_v8 }
 0x247   :  { %2511 = vmatmul.mubr.bf16.vlgmr.msra.gmra.mxu0 %v4923_v24  ;;  %v4172_v24 = vld [vmem:[%s5469_s3 + $0x46c] ss:$20 sps:$4 sm:$0xff]  }
 0x248   :  { %2452 = vmatpush2.bf16.msra.mxu1 %v4161_v49  ;;  %3702 = vmatprep.mubr.msk.bf16.mxu0 %vm4245_vm1, %v4244_v8 }
 0x249   :  { %2453 = vmatprep.subr.bf16.mxu1 %v4166_v50  ;;  %3699 = vmatpush3.bf16.msra.mxu0 %v4203_v58 }
 0x24a   :  { %3700 = vmatprep.subr.bf16.mxu0 %v4244_v8 }
 0x24c   :  { %2454 = vmatpush2.bf16.msra.mxu1 %v4164_v51 }
 0x24d   :  { %2455 = vmatprep.subr.bf16.mxu1 %v4169_v52  ;;  %3701 = vmatpush3.bf16.msra.mxu0 %v4204_v59 }
 0x24e   :  { %3714 = vmatprep.subr.bf16.mxu0 %v4244_v8 }
 0x250   :  { %2456 = vmatpush2.bf16.msra.mxu1 %v4167_v53 }
 0x251   :  { %2457 = vmatprep.subr.bf16.mxu1 %v4172_v24 }
 0x254   :  { %2458 = vmatpush2.bf16.msra.mxu1 %v4170_v54 }
 0x255   :  { %2459 = vmatprep.subr.bf16.mxu1 %v4175_v55 }
 0x258   :  { %2460 = vmatpush2.bf16.msra.mxu1 %v4173_v56 }
 0x259   :  { %2461 = vmatprep.subr.bf16.mxu1 %v4178_v57 }
 0x25c   :  { %2462 = vmatpush2.bf16.msra.mxu1 %v4176_v61 }
 0x25d   :  { %2463 = vmatprep.subr.bf16.mxu1 %v4181_v62 }
 0x260   :  { %2464 = vmatpush2.bf16.msra.mxu1 %v4179_v63 }
 0x261   :  { %2465 = vmatprep.subr.bf16.mxu1 %v4184_v0 }
 0x264   :  { %2466 = vmatpush2.bf16.msra.mxu1 %v4182_v1 }
 0x265   :  { %3591 = vmatprep.subr.bf16.mxu1 %v5223_v2 }
 0x267   :  { %2468 = vmatmul.mubr.bf16.vlgmr.msra.gmra.mxu1 %v5033_v20 }
 0x268   :  { %3592 = vmatpush3.bf16.msra.mxu1 %v5228_v3  ;;  %2551 = vmatprep.mubr.bf16.mxu1 %v5023_v17  ;;  %v5290_v17 = vld [vmem:[%s5469_s3 + $0x2e0] ss:$20 sps:$4 sm:$0xff]  }
 0x269   :  { %3593 = vmatprep.subr.bf16.mxu1 %v5234_v4 }
 0x26c   :  { %3594 = vmatpush3.bf16.msra.mxu1 %v5242_v5 }
 0x26d   :  { %3595 = vmatprep.subr.bf16.mxu1 %v5248_v6 }
 0x270   :  { %3596 = vmatpush3.bf16.msra.mxu1 %v5254_v7 }
 0x271   :  { %3597 = vmatprep.subr.bf16.mxu1 %v5260_v10 }
 0x274   :  { %3598 = vmatpush3.bf16.msra.mxu1 %v5266_v13 }
 0x275   :  { %3599 = vmatprep.subr.bf16.mxu1 %v5272_v14 }
 0x278   :  { %3600 = vmatpush3.bf16.msra.mxu1 %v5278_v15 }
 0x279   :  { %3601 = vmatprep.subr.bf16.mxu1 %v5284_v16 }
 0x27c   :  { %3602 = vmatpush3.bf16.msra.mxu1 %v5290_v17 }
 0x27d   :  { %3603 = vmatprep.subr.bf16.mxu1 %v5296_v18 }
 0x280   :  { %3604 = vmatpush3.bf16.msra.mxu1 %v5302_v12 }
 0x281   :  { %3605 = vmatprep.subr.bf16.mxu1 %v5308_v23 }
 0x284   :  { %3606 = vmatpush3.bf16.msra.mxu1 %v5314_v26 }
 0x285   :  { %3706 = vmatprep.subr.bf16.mxu1 %v4244_v8 }
 0x287   :  { %2552 = vmatmul.mubr.bf16.vlgmr.msra.gmra.mxu1 %v5033_v20 }
 0x288   :  { %3707 = vmatpush3.bf16.msra.mxu1 %v5321_v22  ;;  %3710 = vmatprep.mubr.msk.bf16.mxu1 %vm4245_vm1, %v4244_v8 }
 0x289   :  { %3708 = vmatprep.subr.bf16.mxu1 %v4244_v8 }
 0x28c   :  { %3709 = vmatpush3.bf16.msra.mxu1 %v5329_v28 }
 0x28d   :  { %3622 = vmatprep.subr.bf16.mxu1 %v5021_v11 }
 0x28f   :  { %3711 = vmatmul.mubr.msk.bf16.vlgmr.msra.gmra.mxu1 %vm579_vm12, %v2590_v60 }
 0x290   :  { %3623 = vmatpush3.bf16.msra.mxu1 %v5031_v19 }
 0x291   :  { %3624 = vmatprep.subr.bf16.mxu1 %v5043_v21 }
 0x294   :  { %3625 = vmatpush3.bf16.msra.mxu1 %v5054_v9 }
 0x295   :  { %3626 = vmatprep.subr.bf16.mxu1 %v5064_v27 }
 0x298   :  { %3627 = vmatpush3.bf16.msra.mxu1 %v5074_v25 }
 0x299   :  { %3628 = vmatprep.subr.bf16.mxu1 %v5083_v29 }
 0x29c   :  { %3629 = vmatpush3.bf16.msra.mxu1 %v5092_v31 }
 0x29d   :  { %3630 = vmatprep.subr.bf16.mxu1 %v5101_v33 }
 0x2a0   :  { %3631 = vmatpush3.bf16.msra.mxu1 %v5110_v35 }
 0x2a1   :  { %3632 = vmatprep.subr.bf16.mxu1 %v5119_v37 }
 0x2a4   :  { %3633 = vmatpush3.bf16.msra.mxu1 %v5128_v39 }
 0x2a5   :  { %3634 = vmatprep.subr.bf16.mxu1 %v5137_v41 }
 0x2a7   :  { %v2340_v60 = vpop.f32.mrf.mxu0 }
 0x2a8   :  { %3635 = vmatpush3.bf16.msra.mxu1 %v5146_v43 }
 0x2a9   :  { %3636 = vmatprep.subr.bf16.mxu1 %v5155_v45  ;;  %v2342_v11 = vpop.f32.mrf.mxu0 }
 0x2ab   :  { %v2344_v20 = vpop.f32.mrf.mxu0 }
 0x2ac   :  { %3637 = vmatpush3.bf16.msra.mxu1 %v5164_v47 }
 0x2ad   :  { %3722 = vmatprep.subr.bf16.mxu1 %v4244_v8  ;;  %v2346_v30 = vpop.f32.mrf.mxu0 }
 0x2e7   :  { %v2383_v19 = vpop.f32.mrf.mxu1  ;;  %v2426_v43 = vpop.f32.mrf.mxu0 }
 0x2e8   :  { %v2384_v27 = vadd.f32 %v2383_v19, %v2340_v60 }
 0x2e9   :  { %v2385_v21 = vpop.f32.mrf.mxu1  ;;  %v2428_v44 = vpop.f32.mrf.mxu0 }
 0x2ea   :  { %v2386_v9 = vadd.f32 %v2385_v21, %v2342_v11  ;;  %v2570_v35 = vmul.f32 0.01, %v2384_v27  ;;  %vm2560_vm10 = vcmp.gt.f32.partialorder %v2384_v27, 0.0 }
 0x2eb   :  { %v2387_v25 = vpop.f32.mrf.mxu1  ;;  %v2430_v47 = vpop.f32.mrf.mxu0 }
 0x2ec   :  { %v2388_v29 = vadd.f32 %v2387_v25, %v2344_v20  ;;  %v2571_v32 = vmul.f32 0.01, %v2386_v9  ;;  %vm2561_vm9 = vcmp.gt.f32.partialorder %v2386_v9, 0.0  ;;  %v2580_v40 = vsel %vm2560_vm10, %v2384_v27, %v2570_v35 }
 0x2ed   :  { %v2389_v31 = vpop.f32.mrf.mxu1  ;;  %v2432_v53 = vpop.f32.mrf.mxu0 }
 0x2ee   :  { %vm2565_vm8 = vcmp.gt.f32.partialorder %v2388_v29, 0.0  ;;  %v2575_v33 = vmul.f32 0.01, %v2388_v29  ;;  %v2390_v34 = vadd.f32 %v2389_v31, %v2346_v30  ;;  %v2581_v38 = vsel %vm2561_vm9, %v2386_v9, %v2571_v32 }
 0x2f0   :  { %vm2566_vm11 = vcmp.gt.f32.partialorder %v2390_v34, 0.0  ;;  %v2576_v36 = vmul.f32 0.01, %v2390_v34  ;;  %v2585_v37 = vsel %vm2565_vm8, %v2388_v29, %v2575_v33 }
 0x2f1   :  { %v2773_v42 = vpack.c.bf16 %v2585_v37, %v2580_v40 }
 0x2f2   :  { %v2586_v39 = vsel %vm2566_vm11, %v2390_v34, %v2576_v36 }
 0x2f3   :  { %v2774_v41 = vpack.c.bf16 %v2586_v39, %v2581_v38 }
 0x2f5   :  { %2809 = vmatprep.mubr.bf16.mxu1 %v2774_v41 }
 0x2f6   :  { %2810 = vmatmul.mubr.bf16.vlgmr.msra.gmra.mxu1 %v2773_v42 }
 0x2f7   :  { %3723 = vmatpush3.bf16.msra.mxu1 %v4203_v58  ;;  %3726 = vmatprep.mubr.msk.bf16.mxu1 %vm4245_vm1, %v4244_v8 }
 0x2f8   :  { %3724 = vmatprep.subr.bf16.mxu1 %v4244_v8 }
 0x2fb   :  { %3725 = vmatpush3.bf16.msra.mxu1 %v4204_v59 }
 0x2fc   :  { %3738 = vmatprep.subr.bf16.mxu1 %v4244_v8 }
 0x307   :  { %v3585_v59 = vpop.f32.mrf.mxu0 }
 0x309   :  { %v3586_v60 = vpop.f32.mrf.mxu0 }
 0x30a   :  { %v3587_v21 = vadd.f32 %v3586_v60, %v3585_v59 }
 0x30b   :  { %v3588_v11 = vpop.f32.mrf.mxu0 }
 0x30d   :  { %v3589_v27 = vpop.f32.mrf.mxu0 }
 0x30e   :  { %v3590_v31 = vadd.f32 %v3589_v27, %v3588_v11 }
 0x327   :  { %v2469_v45 = vpop.f32.mrf.mxu1 }
 0x328   :  { %v2470_v46 = vadd.f32 %v2469_v45, %v2426_v43  ;;  %v5380_v43 = vld [vmem:[%s5470_s4 + $0x38] sm:$0xff]  }
 0x329   :  { %v2471_v48 = vpop.f32.mrf.mxu1 }
 0x32a   :  { %v2472_v49 = vadd.f32 %v2471_v48, %v2428_v44  ;;  %v2572_v51 = vmul.f32 0.01, %v2470_v46  ;;  %vm2562_vm13 = vcmp.gt.f32.partialorder %v2470_v46, 0.0  ;;  %v5387_v44 = vld [vmem:[%s5470_s4 + $0x30] sm:$0xff]  }
 0x32b   :  { %v2473_v50 = vpop.f32.mrf.mxu1 }
 0x32c   :  { %v2474_v52 = vadd.f32 %v2473_v50, %v2430_v47  ;;  %v2573_v54 = vmul.f32 0.01, %v2472_v49  ;;  %vm2563_vm15 = vcmp.gt.f32.partialorder %v2472_v49, 0.0  ;;  %v5368_v57 = vsel %vm2562_vm13, %v2470_v46, %v2572_v51 }
 0x32d   :  { %v2475_v24 = vpop.f32.mrf.mxu1 }
 0x32e   :  { %vm2567_vm14 = vcmp.gt.f32.partialorder %v2474_v52, 0.0  ;;  %v2577_v55 = vmul.f32 0.01, %v2474_v52  ;;  %v2476_v56 = vadd.f32 %v2475_v24, %v2432_v53  ;;  %v2583_v0 = vsel %vm2563_vm15, %v2472_v49, %v2573_v54 }
 0x330   :  { %v5370_v61 = vsel %vm2567_vm14, %v2474_v52, %v2577_v55  ;;  %vm2568_vm0 = vcmp.gt.f32.partialorder %v2476_v56, 0.0  ;;  %v2578_v62 = vmul.f32 0.01, %v2476_v56 }
 0x331   :  { %v2775_v63 = vpack.c.bf16 %v5370_v61, %v5368_v57 }
 0x332   :  { %v2588_v1 = vsel %vm2568_vm0, %v2476_v56, %v2578_v62 }
 0x333   :  { %v2776_v58 = vpack.c.bf16 %v2588_v1, %v2583_v0 }
 0x347   :  { %v3607_v19 = vpop.f32.mrf.mxu1 }
 0x349   :  { %v3608_v20 = vpop.f32.mrf.mxu1 }
 0x34a   :  { %v3609_v9 = vadd.f32 %v3608_v20, %v3607_v19 }
 0x34b   :  { %v3610_v25 = vpop.f32.mrf.mxu1 }
 0x34c   :  { %v2554_v29 = vadd.f32 %v3609_v9, %v3587_v21 }
 0x34d   :  { %v3611_v30 = vpop.f32.mrf.mxu1 }
 0x34e   :  { %v3612_v32 = vadd.f32 %v3611_v30, %v3610_v25  ;;  %v2574_v34 = vmul.f32 0.01, %v2554_v29  ;;  %vm2564_vm2 = vcmp.gt.f32.partialorder %v2554_v29, 0.0 }
 0x34f   :  { %v2697_v33 = vpop.f32.mrf.mxu1 }
 0x350   :  { %v2557_v35 = vadd.f32 %v3612_v32, %v3590_v31  ;;  %v2584_v39 = vsel %vm2564_vm2, %v2554_v29, %v2574_v34 }
 0x351   :  { %v3712_v36 = vpop.f32.mrf.mxu1 }
 0x352   :  { %vm2569_vm3 = vcmp.gt.f32.partialorder %v2557_v35, 0.0  ;;  %v2579_v37 = vmul.f32 0.01, %v2557_v35  ;;  %v4207_v36 = vld [vmem:[%s5470_s4 + $0x48] sm:$0xff]  }
 0x353   :  { %v2700_v38 = vpop.f32.mrf.mxu1 }
 0x354   :  { %v2589_v40 = vsel %vm2569_vm3, %v2557_v35, %v2579_v37  ;;  %v4208_v37 = vld [vmem:[%s5470_s4 + $0x40] sm:$0xff]  }
 0x355   :  { %v2591_v41 = vpack.c.bf16 %v2589_v40, %v2584_v39  ;;  %v3713_v42 = vpop.f32.mrf.mxu1 }
 0x357   :  { %3703 = vmatmul.mubr.msk.bf16.vlgmr.msra.gmra.mxu0 %vm579_vm12, %v2591_v41 }
 0x358   :  { %3718 = vmatprep.mubr.msk.bf16.mxu0 %vm4245_vm1, %v4244_v8  ;;  %3715 = vmatpush3.bf16.msra.mxu0 %v5380_v43 }
 0x359   :  { %3716 = vmatprep.subr.bf16.mxu0 %v4244_v8 }
 0x35c   :  { %3717 = vmatpush3.bf16.msra.mxu0 %v5387_v44 }
 0x35d   :  { %3644 = vmatprep.subr.bf16.mxu0 %v5223_v2 }
 0x417   :  { %v2641_v45 = vpop.f32.mrf.mxu0 }
 0x418   :  { %v2698_v46 = vadd.f32 %v2697_v33, %v2641_v45 }
 0x419   :  { %v3704_v47 = vpop.f32.mrf.mxu0 }
 0x41a   :  { %v2706_v49 = vmul.f32 0.01, %v2698_v46  ;;  %vm2704_vm4 = vcmp.gt.f32.partialorder %v2698_v46, 0.0  ;;  %v4209_v47 = vld [vmem:[%s5470_s4 + $0x58] sm:$0xff]  }
 0x41b   :  { %v2644_v48 = vpop.f32.mrf.mxu0 }
 0x41c   :  { %v2701_v50 = vadd.f32 %v2700_v38, %v2644_v48  ;;  %v2708_v53 = vsel %vm2704_vm4, %v2698_v46, %v2706_v49  ;;  %v4210_v48 = vld [vmem:[%s5470_s4 + $0x50] sm:$0xff]  }
 0x41d   :  { %v3705_v51 = vpop.f32.mrf.mxu0 }
 0x41e   :  { %vm2705_vm5 = vcmp.gt.f32.partialorder %v2701_v50, 0.0  ;;  %v2707_v52 = vmul.f32 0.01, %v2701_v50 }
 0x420   :  { %v2709_v24 = vsel %vm2705_vm5, %v2701_v50, %v2707_v52 }
 0x421   :  { %v2710_v54 = vpack.c.bf16 %v2709_v24, %v2708_v53 }
 0x423   :  { %3719 = vmatmul.mubr.msk.bf16.vlgmr.msra.gmra.mxu0 %vm579_vm12, %v2710_v54 }
 0x424   :  { %3645 = vmatpush3.bf16.msra.mxu0 %v5228_v3  ;;  %2850 = vmatprep.mubr.bf16.mxu0 %v2776_v58 }
 0x425   :  { %3646 = vmatprep.subr.bf16.mxu0 %v5234_v4 }
 0x428   :  { %3647 = vmatpush3.bf16.msra.mxu0 %v5242_v5 }
 0x429   :  { %3648 = vmatprep.subr.bf16.mxu0 %v5248_v6 }
 0x42c   :  { %3649 = vmatpush3.bf16.msra.mxu0 %v5254_v7 }
 0x42d   :  { %3650 = vmatprep.subr.bf16.mxu0 %v5260_v10 }
 0x430   :  { %3651 = vmatpush3.bf16.msra.mxu0 %v5266_v13 }
 0x431   :  { %3652 = vmatprep.subr.bf16.mxu0 %v5272_v14 }
 0x434   :  { %3653 = vmatpush3.bf16.msra.mxu0 %v5278_v15  ;;  %v3638_v15 = vpop.f32.mrf.mxu1 }
 0x435   :  { %3654 = vmatprep.subr.bf16.mxu0 %v5284_v16 }
 0x436   :  { %v3639_v16 = vpop.f32.mrf.mxu1 }
 0x438   :  { %3655 = vmatpush3.bf16.msra.mxu0 %v5290_v17  ;;  %v3641_v17 = vpop.f32.mrf.mxu1 }
 0x439   :  { %3656 = vmatprep.subr.bf16.mxu0 %v5296_v18 }
 0x43c   :  { %3657 = vmatpush3.bf16.msra.mxu0 %v5302_v12 }
 0x43d   :  { %3658 = vmatprep.subr.bf16.mxu0 %v5308_v23  ;;  %v3640_v23 = vadd.f32 %v3639_v16, %v3638_v15 }
 0x440   :  { %3659 = vmatpush3.bf16.msra.mxu0 %v5314_v26 }
 0x441   :  { %3730 = vmatprep.subr.bf16.mxu0 %v4244_v8 }
 0x443   :  { %2851 = vmatmul.mubr.bf16.vlgmr.msra.gmra.mxu0 %v2775_v63 }
 0x444   :  { %3731 = vmatpush3.bf16.msra.mxu0 %v5321_v22  ;;  %3734 = vmatprep.mubr.msk.bf16.mxu0 %vm4245_vm1, %v4244_v8  ;;  %v3642_v22 = vpop.f32.mrf.mxu1 }
 0x445   :  { %3732 = vmatprep.subr.bf16.mxu0 %v4244_v8  ;;  %v3643_v57 = vadd.f32 %v3642_v22, %v3641_v17 }
 0x448   :  { %3733 = vmatpush3.bf16.msra.mxu0 %v5329_v28 }
 0x449   :  { %3746 = vmatprep.subr.bf16.mxu0 %v4244_v8 }
 0x4e3   :  { %v2760_v2 = vpop.f32.mrf.mxu0 }
 0x4e4   :  { %v2769_v4 = vmul.f32 0.01, %v2760_v2  ;;  %vm2767_vm6 = vcmp.gt.f32.partialorder %v2760_v2, 0.0 }
 0x4e5   :  { %v3720_v3 = vpop.f32.mrf.mxu0 }
 0x4e6   :  { %v2771_v10 = vsel %vm2767_vm6, %v2760_v2, %v2769_v4 }
 0x4e7   :  { %v2763_v5 = vpop.f32.mrf.mxu0 }
 0x4e8   :  { %vm2768_vm7 = vcmp.gt.f32.partialorder %v2763_v5, 0.0  ;;  %v2770_v6 = vmul.f32 0.01, %v2763_v5 }
 0x4e9   :  { %v3721_v7 = vpop.f32.mrf.mxu0 }
 0x4ea   :  { %v2772_v13 = vsel %vm2768_vm7, %v2763_v5, %v2770_v6  ;;  %v4211_v6 = vld [vmem:[%s5470_s4 + $0x68] sm:$0xff]   ;;  %v4212_v7 = vld [vmem:[%s5470_s4 + $0x60] sm:$0xff]   ;;  %s4246_s4 = smov [#allocation2]  }
 0x4eb   :  { %v2865_v14 = vpack.c.bf16 %v2772_v13, %v2771_v10  ;;  %s3233_s30 = sshll.u32 %s4246_s4, 4  ;;  %s3234_s30 = int_to_ptr.vmem [resolvable:$true] %s3233_s30 }
 0x4ec   :  { %s4221_s6 = scalar_lea.vmem %s3234_s30, 256  ;;  %p4226_p1 = scmp.lt.s32.totalorder %s3234_s30, %s3234_s30 }
 0x4ed   :  { %3735 = vmatmul.mubr.msk.bf16.vlgmr.msra.gmra.mxu0 %vm579_vm12, %v2865_v14  ;;  %p4222_p0 = scmp.ne.s32.totalorder %s3234_s30, %s4221_s6  ;;  %p4227_p2 = scmp.lt.s32.totalorder %s4221_s6, %s4221_s6 }
 0x4ee   :  { %3750 = vmatprep.mubr.msk.bf16.mxu0 %vm4245_vm1, %v4244_v8  ;;  %3747 = vmatpush3.bf16.msra.mxu0 %v4207_v36 }
 0x4ef   :  { %3748 = vmatprep.subr.bf16.mxu0 %v4244_v8  ;;  %p4228_p3 = por %p4227_p2, %p4226_p1 }
 0x4f1   :  { %p4229_p4 = pnand %p4228_p3, %p4222_p0 }
 0x4f2   :  { %3749 = vmatpush3.bf16.msra.mxu0 %v4208_v37 }
 0x4f3   :  { %3762 = vmatprep.subr.bf16.mxu0 %v4244_v8 }
 0x503   :  { %v3660_v18 = vpop.f32.mrf.mxu0 }
 0x505   :  { %v3661_v12 = vpop.f32.mrf.mxu0 }
 0x506   :  { %v3662_v26 = vadd.f32 %v3661_v12, %v3660_v18 }
 0x507   :  { %v3663_v28 = vpop.f32.mrf.mxu0 }
 0x508   :  { %v2853_v55 = vadd.f32 %v3662_v26, %v3640_v23 }
 0x509   :  { %v3664_v56 = vpop.f32.mrf.mxu0 }
 0x50a   :  { %v3665_v61 = vadd.f32 %v3664_v56, %v3663_v28  ;;  %v2861_v62 = vmul.f32 0.01, %v2853_v55  ;;  %vm2859_vm8 = vcmp.gt.f32.partialorder %v2853_v55, 0.0 }
 0x50c   :  { %v2856_v63 = vadd.f32 %v3665_v61, %v3643_v57  ;;  %v2863_v1 = vsel %vm2859_vm8, %v2853_v55, %v2861_v62 }
 0x50e   :  { %vm2860_vm9 = vcmp.gt.f32.partialorder %v2856_v63, 0.0  ;;  %v2862_v0 = vmul.f32 0.01, %v2856_v63 }
 0x510   :  { %v2864_v58 = vsel %vm2860_vm9, %v2856_v63, %v2862_v0 }
 0x511   :  { %v2866_v59 = vpack.c.bf16 %v2864_v58, %v2863_v1 }
 0x513   :  { %3727 = vmatmul.mubr.msk.bf16.vlgmr.msra.gmra.mxu1 %vm579_vm12, %v2866_v59 }
 0x514   :  { %3739 = vmatpush3.bf16.msra.mxu1 %v5380_v43  ;;  %3742 = vmatprep.mubr.msk.bf16.mxu1 %vm4245_vm1, %v4244_v8 }
 0x515   :  { %3740 = vmatprep.subr.bf16.mxu1 %v4244_v8 }
 0x518   :  { %3741 = vmatpush3.bf16.msra.mxu1 %v5387_v44 }
 0x519   :  { %3754 = vmatprep.subr.bf16.mxu1 %v4244_v8 }
 0x5ad   :  { %v2948_v60 = vpop.f32.mrf.mxu0 }
 0x5af   :  { %v3736_v11 = vpop.f32.mrf.mxu0 }
 0x5b1   :  { %v2951_v19 = vpop.f32.mrf.mxu0 }
 0x5b3   :  { %v3737_v20 = vpop.f32.mrf.mxu0 }
 0x5d3   :  { %v2904_v21 = vpop.f32.mrf.mxu1 }
 0x5d4   :  { %v2949_v9 = vadd.f32 %v2948_v60, %v2904_v21 }
 0x5d5   :  { %v3728_v27 = vpop.f32.mrf.mxu1 }
 0x5d6   :  { %v2957_v29 = vmul.f32 0.01, %v2949_v9  ;;  %vm2955_vm10 = vcmp.gt.f32.partialorder %v2949_v9, 0.0 }
 0x5d7   :  { %v2907_v25 = vpop.f32.mrf.mxu1 }
 0x5d8   :  { %v2952_v30 = vadd.f32 %v2951_v19, %v2907_v25  ;;  %v2959_v33 = vsel %vm2955_vm10, %v2949_v9, %v2957_v29 }
 0x5d9   :  { %v3729_v31 = vpop.f32.mrf.mxu1 }
 0x5da   :  { %vm2956_vm11 = vcmp.gt.f32.partialorder %v2952_v30, 0.0  ;;  %v2958_v32 = vmul.f32 0.01, %v2952_v30 }
 0x5dc   :  { %v2960_v34 = vsel %vm2956_vm11, %v2952_v30, %v2958_v32 }
 0x5dd   :  { %v2961_v35 = vpack.c.bf16 %v2960_v34, %v2959_v33 }
 0x5df   :  { %3743 = vmatmul.mubr.msk.bf16.vlgmr.msra.gmra.mxu1 %vm579_vm12, %v2961_v35 }
 0x5e0   :  { %3758 = vmatprep.mubr.msk.bf16.mxu1 %vm4245_vm1, %v4244_v8  ;;  %3755 = vmatpush3.bf16.msra.mxu1 %v4209_v47 }
 0x5e1   :  { %3756 = vmatprep.subr.bf16.mxu1 %v4244_v8 }
 0x5e4   :  { %3757 = vmatpush3.bf16.msra.mxu1 %v4210_v48 }
 0x69f   :  { %v2999_v38 = vpop.f32.mrf.mxu1 }
 0x6a0   :  { %v3008_v40 = vmul.f32 0.01, %v2999_v38  ;;  %vm3006_vm13 = vcmp.gt.f32.partialorder %v2999_v38, 0.0 }
 0x6a1   :  { %v3744_v39 = vpop.f32.mrf.mxu1 }
 0x6a2   :  { %v3010_v44 = vsel %vm3006_vm13, %v2999_v38, %v3008_v40 }
 0x6a3   :  { %v3002_v41 = vpop.f32.mrf.mxu1 }
 0x6a4   :  { %vm3007_vm14 = vcmp.gt.f32.partialorder %v3002_v41, 0.0  ;;  %v3009_v42 = vmul.f32 0.01, %v3002_v41 }
 0x6a5   :  { %v3745_v43 = vpop.f32.mrf.mxu1 }
 0x6a6   :  { %v3011_v45 = vsel %vm3007_vm14, %v3002_v41, %v3009_v42 }
 0x6a7   :  { %v3012_v46 = vpack.c.bf16 %v3011_v45, %v3010_v44 }
 0x6a9   :  { %3751 = vmatmul.mubr.msk.bf16.vlgmr.msra.gmra.mxu0 %vm579_vm12, %v3012_v46 }
 0x6aa   :  { %3766 = vmatprep.mubr.msk.bf16.mxu0 %vm4245_vm1, %v4244_v8  ;;  %3763 = vmatpush3.bf16.msra.mxu0 %v4211_v6 }
 0x6ab   :  { %3764 = vmatprep.subr.bf16.mxu0 %v4244_v8  ;;  %v3199_v8 = vlaneseq }
 0x6ad   :  { %v3200_v28 = vand.u32 127, %v3199_v8 }
 0x6ae   :  { %3765 = vmatpush3.bf16.msra.mxu0 %v4212_v7 }
 0x6af   :  { %vm3201_vm3 = vcmp.lt.s32.totalorder %v3200_v28, 5 }
 0x769   :  { %v3062_v49 = vpop.f32.mrf.mxu0 }
 0x76a   :  { %v3071_v50 = vmul.f32 0.01, %v3062_v49  ;;  %vm3069_vm15 = vcmp.gt.f32.partialorder %v3062_v49, 0.0 }
 0x76b   :  { %v3752_v51 = vpop.f32.mrf.mxu0 }
 0x76c   :  { %v3073_v53 = vsel %vm3069_vm15, %v3062_v49, %v3071_v50 }
 0x76d   :  { %v3065_v52 = vpop.f32.mrf.mxu0  ;;  %v3075_v3 = vadd.f32 %v3073_v53, %v3010_v44 }
 0x76e   :  { %vm3070_vm0 = vcmp.gt.f32.partialorder %v3065_v52, 0.0  ;;  %v3072_v24 = vmul.f32 0.01, %v3065_v52 }
 0x76f   :  { %v3753_v54 = vpop.f32.mrf.mxu0 }
 0x770   :  { %v3074_v2 = vsel %vm3070_vm0, %v3065_v52, %v3072_v24 }
 0x771   :  { %v3076_v4 = vadd.f32 %v3074_v2, %v3011_v45 }
 0x773   :  { %v3077_v5 = vpack.c.bf16 %v3076_v4, %v3075_v3 }
 0x775   :  { %3759 = vmatmul.mubr.msk.bf16.vlgmr.msra.gmra.mxu1 %vm579_vm12, %v3077_v5 }
 0x835   :  { %v3127_v10 = vpop.f32.mrf.mxu1 }
 0x836   :  { %v3136_v13 = vmul.f32 0.01, %v3127_v10  ;;  %vm3134_vm1 = vcmp.gt.f32.partialorder %v3127_v10, 0.0 }
 0x837   :  { %v3760_v14 = vpop.f32.mrf.mxu1 }
 0x838   :  { %v3138_v16 = vsel %vm3134_vm1, %v3127_v10, %v3136_v13 }
 0x839   :  { %v3130_v15 = vpop.f32.mrf.mxu1  ;;  %v3140_v23 = vadd.f32 %v3138_v16, %v3075_v3 }
 0x83a   :  { %vm3135_vm2 = vcmp.gt.f32.partialorder %v3130_v15, 0.0  ;;  %v3137_v17 = vmul.f32 0.01, %v3130_v15 }
 0x83b   :  { %v3761_v18 = vpop.f32.mrf.mxu1 }
 0x83c   :  { %v3139_v12 = vsel %vm3135_vm2, %v3130_v15, %v3137_v17 }
 0x83d   :  { %v3141_v26 = vadd.f32 %v3139_v12, %v3076_v4 }
 0x83f   :  { %v3142_v22 = vpack.c.bf16 %v3141_v26, %v3140_v23 }
 0x841   :  { %3767 = vmatmul.mubr.msk.bf16.vlgmr.msra.gmra.mxu0 %vm579_vm12, %v3142_v22 }
 0x901   :  { %v3192_v55 = vpop.f32.mrf.mxu0 }
 0x902   :  { %v3202_v56 = vsel %vm3201_vm3, %v3192_v55, -1e+30 }
 0x903   :  { %v3768_v57 = vpop.f32.mrf.mxu0  ;;  %v3204_v61 = vsel %vm579_vm12, %v3202_v56, -inf }
 0x904   :  { %3205 = vmax.xlane.f32.xlu0 %v3204_v61 }
 0x905   :  { %v3195_v62 = vpop.f32.mrf.mxu0 }
 0x906   :  { %v3203_v63 = vsel %vm3201_vm3, %v3195_v62, -1e+30 }
 0x907   :  { %v3769_v0 = vpop.f32.mrf.mxu0  ;;  %v3207_v1 = vsel %vm579_vm12, %v3203_v63, -inf }
 0x908   :  { %3208 = vmax.xlane.f32.xlu0 %v3207_v1 }
 0x98d   :  { %v3206_v58 = vpop.xlane.xlu0 %3205 }
 0x98e   :  { %v3210_v59 = vsub.f32 %v3202_v56, %v3206_v58 }
 0x990   :  { %v3212_v60 = vmul.f32 1.442695, %v3210_v59 }
 0x991   :  { %v3209_v11 = vpop.xlane.xlu0 %3208 }
 0x992   :  { %4213 = vpow2.f32 %v3212_v60  ;;  %v3211_v19 = vsub.f32 %v3203_v63, %v3209_v11 }
 0x994   :  { %v3214_v20 = vmul.f32 1.442695, %v3211_v19 }
 0x996   :  { %4215 = vpow2.f32 %v3214_v20 }
 0x99f   :  { %v4214_v21 = vpop.eup %4213 }
 0x9a0   :  { %v3216_v9 = vsel %vm579_vm12, %v4214_v21, 0.0 }
 0x9a1   :  { %3217 = vadd.xlane.f32.xlu1 %v3216_v9 }
 0x9a3   :  { %v4216_v27 = vpop.eup %4215 }
 0x9a4   :  { %v3219_v25 = vsel %vm579_vm12, %v4216_v27, 0.0 }
 0x9a5   :  { %3220 = vadd.xlane.f32.xlu1 %v3219_v25 }
 0xa2a   :  { %v3218_v29 = vpop.xlane.xlu1 %3217 }
 0xa2b   :  { %4217 = vrcp.f32 %v3218_v29 }
 0xa2e   :  { %v3221_v30 = vpop.xlane.xlu1 %3220 }
 0xa2f   :  { %4219 = vrcp.f32 %v3221_v30 }
 0xa38   :  { %v4218_v31 = vpop.eup %4217 }
 0xa39   :  { %v3223_v32 = vmul.f32 %v4218_v31, %v4214_v21 }
 0xa3b   :  { %3226 = vst.msk [vmem:[#allocation2] sm:$0xff] %vm579_vm12, %v3223_v32 }
 0xa3c   :  { %v4220_v33 = vpop.eup %4219 }
 0xa3d   :  { %v3225_v34 = vmul.f32 %v4220_v33, %v4216_v27 }
 0xa3f   :  { %3227 = vst.msk [vmem:[#allocation2 + $0x8] sm:$0xff] %vm579_vm12, %v3225_v34 }
 0xa40   :  { %4232 = shalt.err (!%p4229_p4)
}
 0xa41   :  { %s4247_s0 = smov 128   ;;  %s4248_s7 = smov 8  }
 0xa42   :  { %3239 = dma.vmem_to_hbm [thread:$0]  %s3234_s30, 256, %s5471_s5, [#allocation3], %s4247_s0, %s4247_s0, %s4248_s7  }
 0xa43   :  { %4241 = dma.done.wait [#allocation3], 256  }
 0xa44   :  { %4242 = vsyncadd [#allocation3], 4294967040 }
 0xa45   :  { %3243 = vsyncpa [#allocation3], 1 }

</bundles_post_ra>
